<compile_context>
chip_gen: v6e
topology: v6e:2x2x1
jax: 0.10.0
libtpu: 0.0.40
codegen_flags: <defaults>
</compile_context>

<pallas_src>
import functools

import jax
import jax.numpy as jnp
from jax import lax
from jax.experimental import pallas as pl
from jax.experimental.pallas import tpu as pltpu


# ---------------------------------------------------------------------------
# Kernel: masked sum / clamped count (accumulated over seq tiles) + L2 norm.
# Grid: (batch_tiles, seq_tiles); seq axis is the reduction ("arbitrary").
# ---------------------------------------------------------------------------
def _masked_pool_l2norm_kernel(emb_ref, mask_ref, out_ref, acc_ref, cnt_ref):
    j = pl.program_id(1)

    @pl.when(j == 0)
    def _init():
        acc_ref[...] = jnp.zeros_like(acc_ref)
        cnt_ref[...] = jnp.zeros_like(cnt_ref)

    emb = emb_ref[...].astype(jnp.float32)      # (TB, TS, D) upcast in-kernel
    m = mask_ref[...]                           # (TB, TS, 1) f32, lane-bcast

    acc_ref[...] += jnp.sum(emb * m, axis=1)    # (TB, D)
    cnt_ref[...] += jnp.sum(m, axis=1)          # (TB, 1)

    @pl.when(j == pl.num_programs(1) - 1)
    def _finalize():
        # torch: clamp(mask.sum(1), min=1e-9); approx reciprocal error cancels
        # exactly under the subsequent L2 normalization.
        denom = jnp.maximum(cnt_ref[...], 1e-9)                    # (TB, 1)
        pooled = acc_ref[...] * pl.reciprocal(denom, approx=True)  # (TB, D)
        # torch F.normalize(p=2, dim=1, eps=1e-12)
        nsq = jnp.sum(pooled * pooled, axis=1, keepdims=True)      # (TB, 1)
        inv_norm = lax.rsqrt(jnp.maximum(nsq, 1e-24))
        out_ref[...] = (pooled * inv_norm).astype(out_ref.dtype)


def _pick_seq_tile(S, target):
    if S <= target:
        return S
    t = target
    while t >= 8:
        if S % t == 0:
            return t
        t //= 2
    return S  # fall back to a full-extent (always legal) block


def mean_pool_l2norm(token_embeddings, eff_mask, *, batch_tile=8, seq_tile=512):
    """token_embeddings: (B, S, D) any float dtype; eff_mask: (B, S, 1) f32."""
    B, S, D = token_embeddings.shape
    TB = batch_tile if (B % batch_tile == 0) else B   # full-dim block if ragged
    TS = _pick_seq_tile(S, seq_tile)
    grid = (B // TB, S // TS)

    emb_bytes = token_embeddings.size * token_embeddings.dtype.itemsize
    cost = pl.CostEstimate(
        flops=2 * B * S * D,
        transcendentals=2 * B,
        bytes_accessed=emb_bytes + eff_mask.size * 4 + B * D * 4,
    )

    return pl.pallas_call(
        _masked_pool_l2norm_kernel,
        out_shape=jax.ShapeDtypeStruct((B, D), jnp.float32),
        grid=grid,
        in_specs=[
            pl.BlockSpec((TB, TS, D), lambda i, j: (i, j, 0)),
            pl.BlockSpec((TB, TS, 1), lambda i, j: (i, j, 0)),
        ],
        out_specs=pl.BlockSpec((TB, D), lambda i, j: (i, 0)),
        scratch_shapes=[
            pltpu.VMEM((TB, D), jnp.float32),   # masked-sum accumulator
            pltpu.VMEM((TB, 1), jnp.float32),   # mask-count accumulator
        ],
        compiler_params=pltpu.CompilerParams(
            dimension_semantics=("parallel", "arbitrary")),
        cost_estimate=cost,
    )(token_embeddings, eff_mask)


# ---------------------------------------------------------------------------
# forward(features, return_type='sentence_embeddings'), clean_context=True,
# normalize=True.  Context stripping is fused as a mask (no gather).
# ---------------------------------------------------------------------------
@functools.partial(jax.jit, static_argnames=("batch_tile", "seq_tile"))
def contextualized_forward(input_ids, token_embeddings, attention_mask,
                           delimiter_id, *, batch_tile=8, seq_tile=512):
    B, S, _ = token_embeddings.shape
    pos = jnp.arange(S, dtype=jnp.int32)[None, :]                  # (1, S)
    is_delim = input_ids == delimiter_id
    has_delim = jnp.any(is_delim, axis=-1, keepdims=True)          # (B, 1)
    delim_pos = jnp.argmax(is_delim, axis=-1).astype(jnp.int32)[:, None]
    # Rows without a delimiter keep all tokens (documented fallback).
    after_ctx = jnp.where(has_delim, pos > delim_pos, True)        # (B, S)
    eff_mask = (after_ctx & (attention_mask > 0)).astype(jnp.float32)[:, :, None]
    return mean_pool_l2norm(token_embeddings, eff_mask,
                            batch_tile=batch_tile, seq_tile=seq_tile)


if __name__ == "__main__":
    B, S, D = 16, 128, 128
    DELIM_ID = 999
    PAD_ID = 0

    key = jax.random.PRNGKey(0)
    k_emb, k_ids, k_delim, k_len = jax.random.split(key, 4)

    # Stand-in backbone output (bf16, like a real SentenceTransformer on TPU).
    token_embeddings = jax.random.normal(
        k_emb, (B, S, D), dtype=jnp.float32).astype(jnp.bfloat16)

    # input_ids with one context delimiter per row (positions 1..9).
    input_ids = jax.random.randint(k_ids, (B, S), 5, 100, dtype=jnp.int32)
    delim_idx = jax.random.randint(k_delim, (B,), 1, 10, dtype=jnp.int32)
    input_ids = jnp.where(jnp.arange(S)[None, :] == delim_idx[:, None],
                          DELIM_ID, input_ids)

    # Right-padded attention mask with per-row valid lengths.
    lens = jax.random.randint(k_len, (B,), 24, S + 1, dtype=jnp.int32)
    attention_mask = (jnp.arange(S)[None, :] < lens[:, None]).astype(jnp.int32)
    input_ids = jnp.where(attention_mask == 0, PAD_ID, input_ids)

    out = contextualized_forward(input_ids, token_embeddings, attention_mask,
                                 DELIM_ID, batch_tile=8, seq_tile=64)
    out = jax.block_until_ready(out)
    assert out.shape == (B, D)

    # Pure-JAX reference (mask-equivalent _strip_context + mean_pooling +
    # F.normalize).
    def ref(ids, emb, mask, delim_id):
        _, Sr = ids.shape
        p = jnp.arange(Sr)[None, :]
        isd = ids == delim_id
        has = jnp.any(isd, axis=-1, keepdims=True)
        dpos = jnp.argmax(isd, axis=-1).astype(jnp.int32)[:, None]
        eff = (jnp.where(has, p > dpos, True) & (mask > 0)).astype(jnp.float32)
        m = eff[:, :, None]
        e = emb.astype(jnp.float32)
        pooled = jnp.sum(e * m, axis=1) / jnp.maximum(jnp.sum(m, axis=1), 1e-9)
        n = jnp.sqrt(jnp.sum(pooled * pooled, axis=1, keepdims=True))
        return pooled / jnp.maximum(n, 1e-12)

    ref_out = ref(input_ids, token_embeddings, attention_mask, DELIM_ID)
    assert jnp.allclose(out, ref_out, atol=2e-3, rtol=2e-3), \
        "mismatch vs reference"

    print("KERNEL_OK")
</pallas_src>

<mosaic_0001>
module attributes {stable_mosaic.version = 11 : i64} {
  func.func @_masked_pool_l2norm_kernel(%arg0: i32, %arg1: i32, %arg2: memref<8x64x128xbf16, #tpu.memory_space<vmem>>, %arg3: memref<8x64x1xf32, #tpu.memory_space<vmem>>, %arg4: memref<8x128xf32, #tpu.memory_space<vmem>>, %arg5: memref<8x128xf32, #tpu.memory_space<vmem>>, %arg6: memref<8x1xf32, #tpu.memory_space<vmem>>) attributes {dimension_semantics = [#tpu.dimension_semantics<parallel>, #tpu.dimension_semantics<arbitrary>], iteration_bounds = array<i64: 2, 2>, scalar_prefetch = 0 : i64, scratch_operands = 2 : i64, tpu.core_type = #tpu.core_type<tc>, window_params = [{transform_indices = @transform_0, window_bounds = array<i64: 8, 64, 128>}, {transform_indices = @transform_1, window_bounds = array<i64: 8, 64, 1>}, {transform_indices = @transform_2, window_bounds = array<i64: 8, 128>}]} {
    %c0_i32 = arith.constant 0 : i32
    %0 = arith.cmpi eq, %arg1, %c0_i32 : i32
    %1 = arith.extui %0 : i1 to i32
    %c0_i32_0 = arith.constant 0 : i32
    %2 = arith.cmpi ne, %1, %c0_i32_0 : i32
    scf.if %2 {
      %cst_16 = arith.constant 0.000000e+00 : f32
      %19 = vector.broadcast %cst_16 : f32 to vector<8x128xf32>
      %c0_17 = arith.constant 0 : index
      %c0_18 = arith.constant 0 : index
      %20 = vector.load %arg5[%c0_17, %c0_18] : memref<8x128xf32, #tpu.memory_space<vmem>>, vector<8x128xf32>
      tpu.vector_store %arg5[%c0_17, %c0_18], %19 {strides = array<i32>} : memref<8x128xf32, #tpu.memory_space<vmem>>, vector<8x128xf32>,
      %cst_19 = arith.constant 0.000000e+00 : f32
      %21 = vector.broadcast %cst_19 : f32 to vector<8x1xf32>
      %c0_20 = arith.constant 0 : index
      %c0_21 = arith.constant 0 : index
      %22 = vector.load %arg6[%c0_20, %c0_21] : memref<8x1xf32, #tpu.memory_space<vmem>>, vector<8x1xf32>
      tpu.vector_store %arg6[%c0_20, %c0_21], %21 {strides = array<i32>} : memref<8x1xf32, #tpu.memory_space<vmem>>, vector<8x1xf32>,
    } else {
    }
    %c0 = arith.constant 0 : index
    %c0_1 = arith.constant 0 : index
    %c0_2 = arith.constant 0 : index
    %3 = vector.load %arg2[%c0, %c0_1, %c0_2] : memref<8x64x128xbf16, #tpu.memory_space<vmem>>, vector<8x64x128xbf16>
    %4 = arith.extf %3 : vector<8x64x128xbf16> to vector<8x64x128xf32>
    %c0_3 = arith.constant 0 : index
    %c0_4 = arith.constant 0 : index
    %c0_5 = arith.constant 0 : index
    %5 = vector.load %arg3[%c0_3, %c0_4, %c0_5] : memref<8x64x1xf32, #tpu.memory_space<vmem>>, vector<8x64x1xf32>
    %c0_6 = arith.constant 0 : index
    %c0_7 = arith.constant 0 : index
    %6 = vector.load %arg5[%c0_6, %c0_7] : memref<8x128xf32, #tpu.memory_space<vmem>>, vector<8x128xf32>
    %7 = vector.broadcast %5 : vector<8x64x1xf32> to vector<8x64x128xf32>
    %8 = arith.mulf %4, %7 : vector<8x64x128xf32>
    %cst = arith.constant dense<0.000000e+00> : vector<8x128xf32>
    %9 = vector.multi_reduction <add>, %8, %cst [1] : vector<8x64x128xf32> to vector<8x128xf32>
    %10 = arith.addf %6, %9 : vector<8x128xf32>
    %c0_8 = arith.constant 0 : index
    %c0_9 = arith.constant 0 : index
    %11 = vector.load %arg5[%c0_8, %c0_9] : memref<8x128xf32, #tpu.memory_space<vmem>>, vector<8x128xf32>
    tpu.vector_store %arg5[%c0_8, %c0_9], %10 {strides = array<i32>} : memref<8x128xf32, #tpu.memory_space<vmem>>, vector<8x128xf32>,
    %c0_10 = arith.constant 0 : index
    %c0_11 = arith.constant 0 : index
    %12 = vector.load %arg6[%c0_10, %c0_11] : memref<8x1xf32, #tpu.memory_space<vmem>>, vector<8x1xf32>
    %cst_12 = arith.constant dense<0.000000e+00> : vector<8x1xf32>
    %13 = vector.multi_reduction <add>, %5, %cst_12 [1] : vector<8x64x1xf32> to vector<8x1xf32>
    %14 = arith.addf %12, %13 : vector<8x1xf32>
    %c0_13 = arith.constant 0 : index
    %c0_14 = arith.constant 0 : index
    %15 = vector.load %arg6[%c0_13, %c0_14] : memref<8x1xf32, #tpu.memory_space<vmem>>, vector<8x1xf32>
    tpu.vector_store %arg6[%c0_13, %c0_14], %14 {strides = array<i32>} : memref<8x1xf32, #tpu.memory_space<vmem>>, vector<8x1xf32>,
    %c1_i32 = arith.constant 1 : i32
    %16 = arith.cmpi eq, %arg1, %c1_i32 : i32
    %17 = arith.extui %16 : i1 to i32
    %c0_i32_15 = arith.constant 0 : i32
    %18 = arith.cmpi ne, %17, %c0_i32_15 : i32
    scf.if %18 {
      %c0_16 = arith.constant 0 : index
      %c0_17 = arith.constant 0 : index
      %19 = vector.load %arg6[%c0_16, %c0_17] : memref<8x1xf32, #tpu.memory_space<vmem>>, vector<8x1xf32>
      %cst_18 = arith.constant 9.99999971E-10 : f32
      %20 = vector.broadcast %cst_18 : f32 to vector<8x1xf32>
      %21 = arith.maximumf %19, %20 : vector<8x1xf32>
      %c0_19 = arith.constant 0 : index
      %c0_20 = arith.constant 0 : index
      %22 = vector.load %arg5[%c0_19, %c0_20] : memref<8x128xf32, #tpu.memory_space<vmem>>, vector<8x128xf32>
      %23 = tpu.reciprocal %21 {approx = true} : vector<8x1xf32> -> vector<8x1xf32>
      %24 = vector.broadcast %23 : vector<8x1xf32> to vector<8x128xf32>
      %25 = arith.mulf %22, %24 : vector<8x128xf32>
      %26 = arith.mulf %25, %25 : vector<8x128xf32>
      %cst_21 = arith.constant dense<0.000000e+00> : vector<8xf32>
      %27 = vector.multi_reduction <add>, %26, %cst_21 [1] : vector<8x128xf32> to vector<8xf32>
      %28 = vector.shape_cast %27 : vector<8xf32> to vector<8x1xf32>
      %cst_22 = arith.constant 1.000000e-24 : f32
      %29 = vector.broadcast %cst_22 : f32 to vector<8x1xf32>
      %30 = arith.maximumf %28, %29 : vector<8x1xf32>
      %31 = math.rsqrt %30 : vector<8x1xf32>
      %32 = vector.broadcast %31 : vector<8x1xf32> to vector<8x128xf32>
      %33 = arith.mulf %25, %32 : vector<8x128xf32>
      %c0_23 = arith.constant 0 : index
      %c0_24 = arith.constant 0 : index
      %34 = vector.load %arg4[%c0_23, %c0_24] : memref<8x128xf32, #tpu.memory_space<vmem>>, vector<8x128xf32>
      tpu.vector_store %arg4[%c0_23, %c0_24], %33 {strides = array<i32>} : memref<8x128xf32, #tpu.memory_space<vmem>>, vector<8x128xf32>,
    } else {
    }
    return
  }
  func.func @transform_0(%arg0: i32, %arg1: i32) -> (i32, i32, i32) {
    %c0_i32 = arith.constant 0 : i32
    %c0_i32_0 = arith.constant 0 : i32
    return %arg0, %arg1, %c0_i32 : i32, i32, i32
  }
  func.func @transform_1(%arg0: i32, %arg1: i32) -> (i32, i32, i32) {
    %c0_i32 = arith.constant 0 : i32
    %c0_i32_0 = arith.constant 0 : i32
    return %arg0, %arg1, %c0_i32 : i32, i32, i32
  }
  func.func @transform_2(%arg0: i32, %arg1: i32) -> (i32, i32) {
    %c0_i32 = arith.constant 0 : i32
    %c0_i32_0 = arith.constant 0 : i32
    return %arg0, %c0_i32 : i32, i32
  }
}

</mosaic_0001>

<bundles_post_ra>
// kernel: contextualized_forward.1
= control target key start
LH: loop header
LB: loop body
LE: loop exit
PB: predicated region body
PF: predicated region fallthrough
CT: control target
= control target key end

     0   :  { %7 = vsyncpa [#allocation7], 0  ;;  %s3049_s0 = inlined_call_operand.vmem [shape: bf16[16,128,128], index: 0, kind: input, shape index: {}]   ;;  %s3050_s1 = inlined_call_operand.vmem [shape: f32[16,128,1], index: 1, kind: input, shape index: {}]   ;;  %s3051_s2 = inlined_call_operand.hbm [shape: f32[16,128], index: 2, kind: output, shape index: {}]  }
   0x1   :  { %9 = vsyncpa [#allocation7 + $0x1], 0  ;;  %s2219_s9 = smov 0   ;;  %s2221_s10 = smov 0  }
   0x2   :  { %s2223_s11 = smov 0   ;;  %s2225_s12 = smov 0  }
   0x3   :  { %s2227_s13 = smov 0   ;;  %s2229_s14 = smov 0  }
   0x4   :  { %s2231_s15 = smov 0   ;;  %s2233_s16 = smov 0  }
   0x5   :  { %s2235_s17 = smov 0   ;;  %s2237_s18 = smov 0  }
   0x6 LB: > { %s1808_s19 = sadd.s32 4294967295, %s2198_s18   ;;  %s1809_s20 = sadd.s32 4294967294, %s2198_s18   ;;  %s2198_s18 = sphi %s2237_s18, %s15_s18   ;;  %s2194_s17 = sphi %s2235_s17, %s3072_s17   ;;  %s2190_s16 = sphi %s2233_s16, %s3071_s16   ;;  %s2186_s15 = sphi %s2231_s15, %s3070_s15   ;;  %s2182_s14 = sphi %s2229_s14, %s3069_s14   ;;  %s2178_s13 = sphi %s2227_s13, %s3068_s13   ;;  %s2174_s12 = sphi %s2225_s12, %s3067_s12   ;;  %s2170_s11 = sphi %s2223_s11, %s3066_s11   ;;  %s2166_s10 = sphi %s2221_s10, %s3065_s10   ;;  %s2162_s9 = sphi %s2219_s9, %s3064_s9  }
   0x7   : > { %s24_s21 = sadd.s32 1, %s2190_s16  ;;  %s27_s22 = sadd.s32 1, %s2194_s17 }
   0x8   : > { %p25_p0 = scmp.ge.s32.totalorder %s24_s21, 2  ;;  %s36_s23 = sadd.s32 1, %s2178_s13 }
   0x9   : > { %p43_p1 = scmp.ne.s32.totalorder %s2178_s13, %s2174_s12  ;;  %p44_p2 = scmp.eq.s32.totalorder %s2198_s18, 0 }
   0xa   : > { %s3074_s21 = smov (%p25_p0, %s24_s21), 0  ;;  %s3076_s22 = smov (!%p25_p0, %s27_s22), %s2194_s17 }
   0xb   : > { %s32_s24 = ssub.s32 %s2190_s16, %s3074_s21  ;;  %p2282_p3 = por %p44_p2, %p43_p1 }
   0xc   : > { %p29_p4 = scmp.ge.s32.totalorder %s3076_s22, 2  ;;  %s90_s26 = sadd.s32 1, %s2170_s11 }
   0xd   : > { %p100_p5 = scmp.ne.s32.totalorder %s2170_s11, %s2166_s10  ;;  %p101_p6 = scmp.eq.s32.totalorder %s1808_s19, 3 }
   0xe   : > { %s3078_s22 = smov (%p29_p4, %s3076_s22), 0  ;;  %p106_p8 = scmp.ne.s32.totalorder %s2166_s10, %s2162_s9 }
   0xf   : > { %p2291_p7 = por %p101_p6, %p100_p5  ;;  %s31_s28 = ssub.s32 %s2194_s17, %s3078_s22 }
  0x10   : > { %p107_p9 = scmp.eq.s32.totalorder %s1809_s20, 3  ;;  %s33_s29 = sor.u32 %s32_s24, %s31_s28 }
  0x11   : > { %p88_p10 = scmp.eq.s32.totalorder %s31_s28, 0  ;;  %p34_p11 = scmp.eq.s32.totalorder %s33_s29, 0 }
  0x12   : > { %p2299_p12 = por %p107_p9, %p106_p8  ;;  %p1811_p13 = scmp.ge.s32.totalorder %s2198_s18, 4 }
  0x13   : > { %s2304_s3 = scalar_select %p88_p10, %s2170_s11, %s90_s26  }
  0x14   : > { %s2307_s4 = scalar_select %p34_p11, %s2178_s13, %s36_s23  }
  0x15   : > { %123 = sbr.rel (%p1811_p13) target bundleno = 88 (0x58), region = 16 }
  0x1a   : > { %126 = sbr.rel (!%p2282_p3) target bundleno = 49 (0x31), region = 20  ;;  %s128_s5 = sand.u32 (%p2282_p3), 1, %s2178_s13  }
  0x1b   : > { %s1814_s6 = sshll.u32 (%p2282_p3), %s2190_s16, 3  ;;  %s1812_s7 = sshll.u32 (%p2282_p3), %s128_s5, 8 }
  0x1c   : > { %s1832_s8 = sshll.u32 (%p2282_p3), %s2194_s17, 7  ;;  %s2323_s28 = scalar_lea.vmem (%p2282_p3), [#allocation4], %s1812_s7 }
  0x1d   : > { %s134_s19 = sadd.s32 (%p2282_p3), %s1832_s8, %s1814_s6 }
  0x1e   : > { %s1816_s20 = sshll.u32 (%p2282_p3), %s134_s19, 2 }
  0x1f   : > { %s2318_s23 = scalar_lea.vmem %s3049_s0, %s1816_s20 }
  0x20   : > { %v153_v0 = vld [vmem:[%s2318_s23] sm:$0xff]   ;;  %v157_v1 = vld [vmem:[%s2318_s23 + $0x8] sm:$0xff]   ;;  %v161_v2 = vld [vmem:[%s2318_s23 + $0x10] sm:$0xff]  }
  0x21   : > { %154 = vst [vmem:[%s2323_s28] sm:$0xff] %v153_v0   ;;  %158 = vst [vmem:[%s2323_s28 + $0x8] sm:$0xff] %v157_v1   ;;  %v165_v3 = vld [vmem:[%s2318_s23 + $0x18] sm:$0xff]   ;;  %v169_v4 = vld [vmem:[%s2318_s23 + $0x40] sm:$0xff]  }
  0x22   : > { %162 = vst [vmem:[%s2323_s28 + $0x10] sm:$0xff] %v161_v2   ;;  %v173_v5 = vld [vmem:[%s2318_s23 + $0x48] sm:$0xff]   ;;  %166 = vst [vmem:[%s2323_s28 + $0x18] sm:$0xff] %v165_v3   ;;  %v177_v6 = vld [vmem:[%s2318_s23 + $0x50] sm:$0xff]  }
  0x23   : > { %170 = vst [vmem:[%s2323_s28 + $0x20] sm:$0xff] %v169_v4   ;;  %174 = vst [vmem:[%s2323_s28 + $0x28] sm:$0xff] %v173_v5   ;;  %v181_v7 = vld [vmem:[%s2318_s23 + $0x58] sm:$0xff]   ;;  %v185_v8 = vld [vmem:[%s2318_s23 + $0x80] sm:$0xff]  }
  0x24   : > { %178 = vst [vmem:[%s2323_s28 + $0x30] sm:$0xff] %v177_v6   ;;  %182 = vst [vmem:[%s2323_s28 + $0x38] sm:$0xff] %v181_v7   ;;  %v189_v9 = vld [vmem:[%s2318_s23 + $0x88] sm:$0xff]   ;;  %v193_v10 = vld [vmem:[%s2318_s23 + $0x90] sm:$0xff]  }
  0x25   : > { %186 = vst [vmem:[%s2323_s28 + $0x40] sm:$0xff] %v185_v8   ;;  %v197_v11 = vld [vmem:[%s2318_s23 + $0x98] sm:$0xff]   ;;  %190 = vst [vmem:[%s2323_s28 + $0x48] sm:$0xff] %v189_v9   ;;  %v201_v12 = vld [vmem:[%s2318_s23 + $0xc0] sm:$0xff]  }
  0x26   : > { %194 = vst [vmem:[%s2323_s28 + $0x50] sm:$0xff] %v193_v10   ;;  %198 = vst [vmem:[%s2323_s28 + $0x58] sm:$0xff] %v197_v11   ;;  %v205_v13 = vld [vmem:[%s2318_s23 + $0xc8] sm:$0xff]   ;;  %v209_v14 = vld [vmem:[%s2318_s23 + $0xd0] sm:$0xff]  }
  0x27   : > { %202 = vst [vmem:[%s2323_s28 + $0x60] sm:$0xff] %v201_v12   ;;  %206 = vst [vmem:[%s2323_s28 + $0x68] sm:$0xff] %v205_v13   ;;  %v213_v15 = vld [vmem:[%s2318_s23 + $0xd8] sm:$0xff]   ;;  %v217_v16 = vld [vmem:[%s2318_s23 + $0x100] sm:$0xff]  }
  0x28   : > { %210 = vst [vmem:[%s2323_s28 + $0x70] sm:$0xff] %v209_v14   ;;  %v221_v17 = vld [vmem:[%s2318_s23 + $0x108] sm:$0xff]   ;;  %214 = vst [vmem:[%s2323_s28 + $0x78] sm:$0xff] %v213_v15   ;;  %v225_v18 = vld [vmem:[%s2318_s23 + $0x110] sm:$0xff]  }
  0x29   : > { %218 = vst [vmem:[%s2323_s28 + $0x80] sm:$0xff] %v217_v16   ;;  %222 = vst [vmem:[%s2323_s28 + $0x88] sm:$0xff] %v221_v17   ;;  %v229_v19 = vld [vmem:[%s2318_s23 + $0x118] sm:$0xff]   ;;  %v233_v20 = vld [vmem:[%s2318_s23 + $0x140] sm:$0xff]  }
  0x2a   : > { %226 = vst [vmem:[%s2323_s28 + $0x90] sm:$0xff] %v225_v18   ;;  %230 = vst [vmem:[%s2323_s28 + $0x98] sm:$0xff] %v229_v19   ;;  %v237_v21 = vld [vmem:[%s2318_s23 + $0x148] sm:$0xff]   ;;  %v241_v22 = vld [vmem:[%s2318_s23 + $0x150] sm:$0xff]  }
  0x2b   : > { %234 = vst [vmem:[%s2323_s28 + $0xa0] sm:$0xff] %v233_v20   ;;  %v245_v23 = vld [vmem:[%s2318_s23 + $0x158] sm:$0xff]   ;;  %238 = vst [vmem:[%s2323_s28 + $0xa8] sm:$0xff] %v237_v21   ;;  %v249_v24 = vld [vmem:[%s2318_s23 + $0x180] sm:$0xff]  }
  0x2c   : > { %242 = vst [vmem:[%s2323_s28 + $0xb0] sm:$0xff] %v241_v22   ;;  %246 = vst [vmem:[%s2323_s28 + $0xb8] sm:$0xff] %v245_v23   ;;  %v253_v25 = vld [vmem:[%s2318_s23 + $0x188] sm:$0xff]   ;;  %v257_v26 = vld [vmem:[%s2318_s23 + $0x190] sm:$0xff]  }
  0x2d   : > { %250 = vst [vmem:[%s2323_s28 + $0xc0] sm:$0xff] %v249_v24   ;;  %254 = vst [vmem:[%s2323_s28 + $0xc8] sm:$0xff] %v253_v25   ;;  %v261_v27 = vld [vmem:[%s2318_s23 + $0x198] sm:$0xff]   ;;  %v265_v28 = vld [vmem:[%s2318_s23 + $0x1c0] sm:$0xff]  }
  0x2e   : > { %258 = vst [vmem:[%s2323_s28 + $0xd0] sm:$0xff] %v257_v26   ;;  %v269_v29 = vld [vmem:[%s2318_s23 + $0x1c8] sm:$0xff]   ;;  %262 = vst [vmem:[%s2323_s28 + $0xd8] sm:$0xff] %v261_v27   ;;  %v273_v30 = vld [vmem:[%s2318_s23 + $0x1d0] sm:$0xff]  }
  0x2f   : > { %266 = vst [vmem:[%s2323_s28 + $0xe0] sm:$0xff] %v265_v28   ;;  %270 = vst [vmem:[%s2323_s28 + $0xe8] sm:$0xff] %v269_v29   ;;  %v277_v31 = vld [vmem:[%s2318_s23 + $0x1d8] sm:$0xff]  }
  0x30   : > { %274 = vst [vmem:[%s2323_s28 + $0xf0] sm:$0xff] %v273_v30   ;;  %278 = vst [vmem:[%s2323_s28 + $0xf8] sm:$0xff] %v277_v31  }
  0x31 PF: > { %432 = sbr.rel (!%p2282_p3) target bundleno = 88 (0x58), region = 61  ;;  %s434_s29 = sand.u32 (%p2282_p3), 1, %s2178_s13  }
  0x32   : > { %s1819_s5 = sshll.u32 (%p2282_p3), %s2190_s16, 3  ;;  %s1817_s6 = sshll.u32 (%p2282_p3), %s434_s29, 9 }
  0x33   : > { %s1833_s7 = sshll.u32 (%p2282_p3), %s2194_s17, 7  ;;  %s2399_s25 = scalar_lea.vmem (%p2282_p3), [#allocation5], %s1817_s6 }
  0x34   : > { %s440_s8 = sadd.s32 (%p2282_p3), %s1833_s7, %s1819_s5 }
  0x35   : > { %s1821_s19 = sshll.u32 (%p2282_p3), %s440_s8, 3 }
  0x36   : > { %s2394_s26 = scalar_lea.vmem %s3050_s1, %s1821_s19 }
  0x37   : > { %v597_v32 = vld [vmem:[%s2394_s26] sm:$0xff]  ;;  %v599_v33 = vld [vmem:[%s2394_s26 + $0x8] sm:$0xff]  ;;  %v601_v34 = vld [vmem:[%s2394_s26 + $0x10] sm:$0xff] }
  0x38   : > { %598 = vst [vmem:[%s2399_s25] sm:$0xff] %v597_v32  ;;  %600 = vst [vmem:[%s2399_s25 + $0x8] sm:$0xff] %v599_v33  ;;  %v603_v35 = vld [vmem:[%s2394_s26 + $0x18] sm:$0xff]  ;;  %v605_v36 = vld [vmem:[%s2394_s26 + $0x20] sm:$0xff] }
  0x39   : > { %602 = vst [vmem:[%s2399_s25 + $0x10] sm:$0xff] %v601_v34  ;;  %v607_v37 = vld [vmem:[%s2394_s26 + $0x28] sm:$0xff]  ;;  %604 = vst [vmem:[%s2399_s25 + $0x18] sm:$0xff] %v603_v35  ;;  %v609_v38 = vld [vmem:[%s2394_s26 + $0x30] sm:$0xff] }
  0x3a   : > { %606 = vst [vmem:[%s2399_s25 + $0x20] sm:$0xff] %v605_v36  ;;  %608 = vst [vmem:[%s2399_s25 + $0x28] sm:$0xff] %v607_v37  ;;  %v611_v39 = vld [vmem:[%s2394_s26 + $0x38] sm:$0xff]  ;;  %v613_v40 = vld [vmem:[%s2394_s26 + $0x80] sm:$0xff] }
  0x3b   : > { %610 = vst [vmem:[%s2399_s25 + $0x30] sm:$0xff] %v609_v38  ;;  %612 = vst [vmem:[%s2399_s25 + $0x38] sm:$0xff] %v611_v39  ;;  %v615_v41 = vld [vmem:[%s2394_s26 + $0x88] sm:$0xff]  ;;  %v617_v42 = vld [vmem:[%s2394_s26 + $0x90] sm:$0xff] }
  0x3c   : > { %614 = vst [vmem:[%s2399_s25 + $0x40] sm:$0xff] %v613_v40  ;;  %v619_v43 = vld [vmem:[%s2394_s26 + $0x98] sm:$0xff]  ;;  %616 = vst [vmem:[%s2399_s25 + $0x48] sm:$0xff] %v615_v41  ;;  %v621_v44 = vld [vmem:[%s2394_s26 + $0xa0] sm:$0xff] }
  0x3d   : > { %618 = vst [vmem:[%s2399_s25 + $0x50] sm:$0xff] %v617_v42  ;;  %620 = vst [vmem:[%s2399_s25 + $0x58] sm:$0xff] %v619_v43  ;;  %v623_v45 = vld [vmem:[%s2394_s26 + $0xa8] sm:$0xff]  ;;  %v625_v46 = vld [vmem:[%s2394_s26 + $0xb0] sm:$0xff] }
  0x3e   : > { %622 = vst [vmem:[%s2399_s25 + $0x60] sm:$0xff] %v621_v44  ;;  %624 = vst [vmem:[%s2399_s25 + $0x68] sm:$0xff] %v623_v45  ;;  %v627_v47 = vld [vmem:[%s2394_s26 + $0xb8] sm:$0xff]  ;;  %v629_v48 = vld [vmem:[%s2394_s26 + $0x100] sm:$0xff] }
  0x3f   : > { %626 = vst [vmem:[%s2399_s25 + $0x70] sm:$0xff] %v625_v46  ;;  %v631_v49 = vld [vmem:[%s2394_s26 + $0x108] sm:$0xff]  ;;  %628 = vst [vmem:[%s2399_s25 + $0x78] sm:$0xff] %v627_v47  ;;  %v633_v50 = vld [vmem:[%s2394_s26 + $0x110] sm:$0xff] }
  0x40   : > { %630 = vst [vmem:[%s2399_s25 + $0x80] sm:$0xff] %v629_v48  ;;  %632 = vst [vmem:[%s2399_s25 + $0x88] sm:$0xff] %v631_v49  ;;  %v635_v51 = vld [vmem:[%s2394_s26 + $0x118] sm:$0xff]  ;;  %v637_v52 = vld [vmem:[%s2394_s26 + $0x120] sm:$0xff] }
  0x41   : > { %634 = vst [vmem:[%s2399_s25 + $0x90] sm:$0xff] %v633_v50  ;;  %636 = vst [vmem:[%s2399_s25 + $0x98] sm:$0xff] %v635_v51  ;;  %v639_v53 = vld [vmem:[%s2394_s26 + $0x128] sm:$0xff]  ;;  %v641_v54 = vld [vmem:[%s2394_s26 + $0x130] sm:$0xff] }
  0x42   : > { %638 = vst [vmem:[%s2399_s25 + $0xa0] sm:$0xff] %v637_v52  ;;  %v643_v55 = vld [vmem:[%s2394_s26 + $0x138] sm:$0xff]  ;;  %640 = vst [vmem:[%s2399_s25 + $0xa8] sm:$0xff] %v639_v53  ;;  %v645_v56 = vld [vmem:[%s2394_s26 + $0x180] sm:$0xff] }
  0x43   : > { %642 = vst [vmem:[%s2399_s25 + $0xb0] sm:$0xff] %v641_v54  ;;  %644 = vst [vmem:[%s2399_s25 + $0xb8] sm:$0xff] %v643_v55  ;;  %v647_v57 = vld [vmem:[%s2394_s26 + $0x188] sm:$0xff]  ;;  %v649_v58 = vld [vmem:[%s2394_s26 + $0x190] sm:$0xff] }
  0x44   : > { %646 = vst [vmem:[%s2399_s25 + $0xc0] sm:$0xff] %v645_v56  ;;  %648 = vst [vmem:[%s2399_s25 + $0xc8] sm:$0xff] %v647_v57  ;;  %v651_v59 = vld [vmem:[%s2394_s26 + $0x198] sm:$0xff]  ;;  %v653_v60 = vld [vmem:[%s2394_s26 + $0x1a0] sm:$0xff] }
  0x45   : > { %650 = vst [vmem:[%s2399_s25 + $0xd0] sm:$0xff] %v649_v58  ;;  %v655_v61 = vld [vmem:[%s2394_s26 + $0x1a8] sm:$0xff]  ;;  %652 = vst [vmem:[%s2399_s25 + $0xd8] sm:$0xff] %v651_v59  ;;  %v657_v62 = vld [vmem:[%s2394_s26 + $0x1b0] sm:$0xff] }
  0x46   : > { %654 = vst [vmem:[%s2399_s25 + $0xe0] sm:$0xff] %v653_v60  ;;  %656 = vst [vmem:[%s2399_s25 + $0xe8] sm:$0xff] %v655_v61  ;;  %v659_v63 = vld [vmem:[%s2394_s26 + $0x1b8] sm:$0xff]  ;;  %v661_v0 = vld [vmem:[%s2394_s26 + $0x200] sm:$0xff] }
  0x47   : > { %658 = vst [vmem:[%s2399_s25 + $0xf0] sm:$0xff] %v657_v62  ;;  %660 = vst [vmem:[%s2399_s25 + $0xf8] sm:$0xff] %v659_v63  ;;  %v663_v1 = vld [vmem:[%s2394_s26 + $0x208] sm:$0xff]  ;;  %v665_v2 = vld [vmem:[%s2394_s26 + $0x210] sm:$0xff] }
  0x48   : > { %662 = vst [vmem:[%s2399_s25 + $0x100] sm:$0xff] %v661_v0  ;;  %v667_v3 = vld [vmem:[%s2394_s26 + $0x218] sm:$0xff]  ;;  %664 = vst [vmem:[%s2399_s25 + $0x108] sm:$0xff] %v663_v1  ;;  %v669_v4 = vld [vmem:[%s2394_s26 + $0x220] sm:$0xff] }
  0x49   : > { %666 = vst [vmem:[%s2399_s25 + $0x110] sm:$0xff] %v665_v2  ;;  %668 = vst [vmem:[%s2399_s25 + $0x118] sm:$0xff] %v667_v3  ;;  %v671_v5 = vld [vmem:[%s2394_s26 + $0x228] sm:$0xff]  ;;  %v673_v6 = vld [vmem:[%s2394_s26 + $0x230] sm:$0xff] }
  0x4a   : > { %670 = vst [vmem:[%s2399_s25 + $0x120] sm:$0xff] %v669_v4  ;;  %672 = vst [vmem:[%s2399_s25 + $0x128] sm:$0xff] %v671_v5  ;;  %v675_v7 = vld [vmem:[%s2394_s26 + $0x238] sm:$0xff]  ;;  %v677_v8 = vld [vmem:[%s2394_s26 + $0x280] sm:$0xff] }
  0x4b   : > { %674 = vst [vmem:[%s2399_s25 + $0x130] sm:$0xff] %v673_v6  ;;  %v679_v9 = vld [vmem:[%s2394_s26 + $0x288] sm:$0xff]  ;;  %676 = vst [vmem:[%s2399_s25 + $0x138] sm:$0xff] %v675_v7  ;;  %v681_v10 = vld [vmem:[%s2394_s26 + $0x290] sm:$0xff] }
  0x4c   : > { %678 = vst [vmem:[%s2399_s25 + $0x140] sm:$0xff] %v677_v8  ;;  %680 = vst [vmem:[%s2399_s25 + $0x148] sm:$0xff] %v679_v9  ;;  %v683_v11 = vld [vmem:[%s2394_s26 + $0x298] sm:$0xff]  ;;  %v685_v12 = vld [vmem:[%s2394_s26 + $0x2a0] sm:$0xff] }
  0x4d   : > { %682 = vst [vmem:[%s2399_s25 + $0x150] sm:$0xff] %v681_v10  ;;  %684 = vst [vmem:[%s2399_s25 + $0x158] sm:$0xff] %v683_v11  ;;  %v687_v13 = vld [vmem:[%s2394_s26 + $0x2a8] sm:$0xff]  ;;  %v689_v14 = vld [vmem:[%s2394_s26 + $0x2b0] sm:$0xff] }
  0x4e   : > { %686 = vst [vmem:[%s2399_s25 + $0x160] sm:$0xff] %v685_v12  ;;  %v691_v15 = vld [vmem:[%s2394_s26 + $0x2b8] sm:$0xff]  ;;  %688 = vst [vmem:[%s2399_s25 + $0x168] sm:$0xff] %v687_v13  ;;  %v693_v16 = vld [vmem:[%s2394_s26 + $0x300] sm:$0xff] }
  0x4f   : > { %690 = vst [vmem:[%s2399_s25 + $0x170] sm:$0xff] %v689_v14  ;;  %692 = vst [vmem:[%s2399_s25 + $0x178] sm:$0xff] %v691_v15  ;;  %v695_v17 = vld [vmem:[%s2394_s26 + $0x308] sm:$0xff]  ;;  %v697_v18 = vld [vmem:[%s2394_s26 + $0x310] sm:$0xff] }
  0x50   : > { %694 = vst [vmem:[%s2399_s25 + $0x180] sm:$0xff] %v693_v16  ;;  %696 = vst [vmem:[%s2399_s25 + $0x188] sm:$0xff] %v695_v17  ;;  %v699_v19 = vld [vmem:[%s2394_s26 + $0x318] sm:$0xff]  ;;  %v701_v20 = vld [vmem:[%s2394_s26 + $0x320] sm:$0xff] }
  0x51   : > { %698 = vst [vmem:[%s2399_s25 + $0x190] sm:$0xff] %v697_v18  ;;  %v703_v21 = vld [vmem:[%s2394_s26 + $0x328] sm:$0xff]  ;;  %700 = vst [vmem:[%s2399_s25 + $0x198] sm:$0xff] %v699_v19  ;;  %v705_v22 = vld [vmem:[%s2394_s26 + $0x330] sm:$0xff] }
  0x52   : > { %702 = vst [vmem:[%s2399_s25 + $0x1a0] sm:$0xff] %v701_v20  ;;  %704 = vst [vmem:[%s2399_s25 + $0x1a8] sm:$0xff] %v703_v21  ;;  %v707_v23 = vld [vmem:[%s2394_s26 + $0x338] sm:$0xff]  ;;  %v709_v24 = vld [vmem:[%s2394_s26 + $0x380] sm:$0xff] }
  0x53   : > { %706 = vst [vmem:[%s2399_s25 + $0x1b0] sm:$0xff] %v705_v22  ;;  %708 = vst [vmem:[%s2399_s25 + $0x1b8] sm:$0xff] %v707_v23  ;;  %v711_v25 = vld [vmem:[%s2394_s26 + $0x388] sm:$0xff]  ;;  %v713_v26 = vld [vmem:[%s2394_s26 + $0x390] sm:$0xff] }
  0x54   : > { %710 = vst [vmem:[%s2399_s25 + $0x1c0] sm:$0xff] %v709_v24  ;;  %v715_v27 = vld [vmem:[%s2394_s26 + $0x398] sm:$0xff]  ;;  %712 = vst [vmem:[%s2399_s25 + $0x1c8] sm:$0xff] %v711_v25  ;;  %v717_v28 = vld [vmem:[%s2394_s26 + $0x3a0] sm:$0xff] }
  0x55   : > { %714 = vst [vmem:[%s2399_s25 + $0x1d0] sm:$0xff] %v713_v26  ;;  %716 = vst [vmem:[%s2399_s25 + $0x1d8] sm:$0xff] %v715_v27  ;;  %v719_v29 = vld [vmem:[%s2394_s26 + $0x3a8] sm:$0xff]  ;;  %v721_v30 = vld [vmem:[%s2394_s26 + $0x3b0] sm:$0xff] }
  0x56   : > { %718 = vst [vmem:[%s2399_s25 + $0x1e0] sm:$0xff] %v717_v28  ;;  %720 = vst [vmem:[%s2399_s25 + $0x1e8] sm:$0xff] %v719_v29  ;;  %v723_v31 = vld [vmem:[%s2394_s26 + $0x3b8] sm:$0xff] }
  0x57   : > { %722 = vst [vmem:[%s2399_s25 + $0x1f0] sm:$0xff] %v721_v30  ;;  %724 = vst [vmem:[%s2399_s25 + $0x1f8] sm:$0xff] %v723_v31 }
  0x58 PF: > { %p1822_p0 = scmp.ge.s32.totalorder %s2198_s18, 1  ;;  %p729_p1 = scmp.lt.s32.totalorder %s2198_s18, 5 }
  0x5a   : > { %p730_p2 = pnand %p1822_p0, %p729_p1 }
  0x5c   : > { %733 = sbr.rel (%p730_p2) target bundleno = 706 (0x2c2), region = 99 }
  0x61   : > { %s736_s23 = sand.u32 1, %s2174_s12   ;;  %s765_s28 = sand.u32 1, %s2166_s10  }
  0x62   : > { %s1823_s29 = sshll.u32 %s736_s23, 8  ;;  %s1824_s5 = sshll.u32 %s736_s23, 9 }
  0x63   : > { %s2532_s6 = sshll.u32 %s765_s28, 3  ;;  %s2534_s7 = scalar_lea.vmem [#allocation4], %s1823_s29 }
  0x64   : > { %s2536_s8 = scalar_lea.vmem [#allocation5], %s1824_s5  ;;  %s767_s19 = scalar_lea.vmem [#allocation6], %s2532_s6 }
  0x65   : > { %p1826_p3 = scmp.ne.s32.totalorder %s2182_s14, 0 }
  0x67   : > { %775 = sbr.rel (%p1826_p3) target bundleno = 110 (0x6e), region = 111 }
  0x6c   : > { %vm777_vm0 = vcmask 7168   ;;  %v2200_v32 = vmov 0.0  }
  0x6d   : > { %776 = vst [vmem:[#allocation2] sm:$0xff] %v2200_v32  ;;  %778 = vst.msk [vmem:[#allocation3] sm:$0xff] %vm777_vm0, %v2200_v32 }
  0x6e PF: > { %v909_v33 = vld [vmem:[%s2536_s8 + $0x10] sm:$0xff]  ;;  %vm1486_vm1 = vcmask 7168   ;;  %v907_v34 = vld [vmem:[%s2536_s8] sm:$0xff]  ;;  %v2201_v35 = vmov 0   ;;  %v908_v37 = vld [vmem:[%s2536_s8 + $0x8] sm:$0xff]  ;;  %vm1468_vm2 = vcmask 1041409  }
  0x6f   : > { %2084 = vset.pattern.permute.xlu1 %v2201_v35  ;;  %2083 = vset.pattern.permute.xlu0 %v2201_v35  ;;  %v1487_v36 = vsel %vm1486_vm1, %v907_v34, 0.0  ;;  %v1490_v38 = vsel %vm1486_vm1, %v909_v33, 0.0  ;;  %v1488_v39 = vsel %vm1486_vm1, %v908_v37, 0.0  ;;  %v2547_v40 = vld [vmem:[%s2536_s8 + $0x48] sm:$0xff]  ;;  %v910_v41 = vld [vmem:[%s2536_s8 + $0x18] sm:$0xff]  ;;  %v2553_v44 = vld [vmem:[%s2536_s8 + $0x40] sm:$0xff] }
  0x70   : > { %984 = vperm.xlu1 %2084, %v909_v33   ;;  %974 = vperm.xlu0 %2083, %v907_v34   ;;  %v1489_v42 = vadd.f32 %v1488_v39, %v1487_v36  ;;  %v1509_v43 = vsel %vm1486_vm1, %v2547_v40, 0.0  ;;  %v2556_v45 = vld [vmem:[%s2536_s8 + $0x50] sm:$0xff]  ;;  %v1492_v46 = vsel %vm1486_vm1, %v910_v41, 0.0  ;;  %v912_v47 = vld [vmem:[%s2536_s8 + $0x28] sm:$0xff]  ;;  %v911_v48 = vld [vmem:[%s2536_s8 + $0x20] sm:$0xff]  ;;  %v1508_v50 = vsel %vm1486_vm1, %v2553_v44, 0.0 }
  0x71   : > { %v2562_v49 = vld [vmem:[%s2536_s8 + $0x38] sm:$0xff]  ;;  %v1511_v51 = vsel %vm1486_vm1, %v2556_v45, 0.0  ;;  %v1496_v53 = vsel %vm1486_vm1, %v912_v47, 0.0  ;;  %v1494_v54 = vsel %vm1486_vm1, %v911_v48, 0.0  ;;  %v1510_v55 = vadd.f32 %v1509_v43, %v1508_v50  ;;  %v2574_v57 = vld [vmem:[%s2536_s8 + $0x88] sm:$0xff]  ;;  %v2577_v58 = vld [vmem:[%s2536_s8 + $0x80] sm:$0xff] }
  0x72   : > { %v1491_v52 = vadd.f32 %v1490_v38, %v1489_v42  ;;  %v2571_v56 = vld [vmem:[%s2536_s8 + $0x58] sm:$0xff]  ;;  %v1500_v59 = vsel %vm1486_vm1, %v2562_v49, 0.0  ;;  %v913_v60 = vld [vmem:[%s2536_s8 + $0x30] sm:$0xff]  ;;  %v2585_v62 = vld [vmem:[%s2536_s8 + $0x68] sm:$0xff]  ;;  %v1530_v63 = vsel %vm1486_vm1, %v2574_v57, 0.0  ;;  %v1529_v0 = vsel %vm1486_vm1, %v2577_v58, 0.0 }
  0x73   : > { %v1513_v61 = vsel %vm1486_vm1, %v2571_v56, 0.0  ;;  %v1498_v2 = vsel %vm1486_vm1, %v913_v60, 0.0  ;;  %v1512_v3 = vadd.f32 %v1511_v51, %v1510_v55  ;;  %v2593_v4 = vld [vmem:[%s2536_s8 + $0x60] sm:$0xff]  ;;  %v1531_v5 = vadd.f32 %v1530_v63, %v1529_v0  ;;  %v2596_v6 = vld [vmem:[%s2536_s8 + $0x98] sm:$0xff]  ;;  %v2599_v7 = vld [vmem:[%s2536_s8 + $0x90] sm:$0xff]  ;;  %p1827_p4 = scmp.ne.s32.totalorder %s2182_s14, 1 }
  0x74   : > { %989 = vperm.xlu1 %2084, %v910_v41   ;;  %979 = vperm.xlu0 %2083, %v908_v37   ;;  %v1493_v1 = vadd.f32 %v1492_v46, %v1491_v52  ;;  %v1517_v8 = vsel %vm1486_vm1, %v2585_v62, 0.0  ;;  %v1515_v9 = vsel %vm1486_vm1, %v2593_v4, 0.0  ;;  %v2606_v10 = vld [vmem:[%s2536_s8 + $0x78] sm:$0xff]  ;;  %v2609_v11 = vld [vmem:[%s2536_s8 + $0x70] sm:$0xff]  ;;  %v1534_v12 = vsel %vm1486_vm1, %v2596_v6, 0.0  ;;  %v2618_v18 = vld [vmem:[%s2536_s8 + $0xa0] sm:$0xff] }
  0x75   : > { %v1532_v13 = vsel %vm1486_vm1, %v2599_v7, 0.0  ;;  %v1514_v15 = vadd.f32 %v1513_v61, %v1512_v3  ;;  %v1521_v16 = vsel %vm1486_vm1, %v2606_v10, 0.0  ;;  %v2621_v19 = vld [vmem:[%s2536_s8 + $0xc8] sm:$0xff]  ;;  %v2624_v20 = vld [vmem:[%s2536_s8 + $0xc0] sm:$0xff]  ;;  %v1519_v21 = vsel %vm1486_vm1, %v2609_v11, 0.0  ;;  %v2638_v29 = vld [vmem:[%s2536_s8 + $0xb8] sm:$0xff] }
  0x76   : > { %v1495_v14 = vadd.f32 %v1494_v54, %v1493_v1  ;;  %v1533_v17 = vadd.f32 %v1532_v13, %v1531_v5  ;;  %v2629_v22 = vld [vmem:[%s2536_s8 + $0xa8] sm:$0xff]  ;;  %v1536_v23 = vsel %vm1486_vm1, %v2618_v18, 0.0  ;;  %v1551_v24 = vsel %vm1486_vm1, %v2621_v19, 0.0  ;;  %v2641_v31 = vld [vmem:[%s2536_s8 + $0xd8] sm:$0xff]  ;;  %v2644_v32 = vld [vmem:[%s2536_s8 + $0xd0] sm:$0xff] }
  0x77   : > { %v1550_v25 = vsel %vm1486_vm1, %v2624_v20, 0.0  ;;  %v1516_v27 = vadd.f32 %v1515_v9, %v1514_v15  ;;  %v1538_v33 = vsel %vm1486_vm1, %v2629_v22, 0.0  ;;  %v1542_v34 = vsel %vm1486_vm1, %v2638_v29, 0.0  ;;  %v2651_v35 = vld [vmem:[%s2536_s8 + $0xb0] sm:$0xff]  ;;  %v2658_v43 = vld [vmem:[%s2536_s8 + $0xe0] sm:$0xff]  ;;  %v2661_v46 = vld [vmem:[%s2536_s8 + $0x108] sm:$0xff] }
  0x78   : > { %999 = vperm.xlu1 %2084, %v912_v47   ;;  %994 = vperm.xlu0 %2083, %v911_v48   ;;  %v1497_v26 = vadd.f32 %v1496_v53, %v1495_v14  ;;  %v1535_v28 = vadd.f32 %v1534_v12, %v1533_v17  ;;  %v1552_v30 = vadd.f32 %v1551_v24, %v1550_v25  ;;  %v1555_v36 = vsel %vm1486_vm1, %v2641_v31, 0.0  ;;  %v2664_v47 = vld [vmem:[%s2536_s8 + $0x100] sm:$0xff]  ;;  %v2679_v61 = vld [vmem:[%s2536_s8 + $0x118] sm:$0xff]  ;;  %v2682_v63 = vld [vmem:[%s2536_s8 + $0x110] sm:$0xff] }
  0x79   : > { %v1553_v37 = vsel %vm1486_vm1, %v2644_v32, 0.0  ;;  %v1518_v39 = vadd.f32 %v1517_v8, %v1516_v27  ;;  %v1540_v48 = vsel %vm1486_vm1, %v2651_v35, 0.0  ;;  %v1557_v50 = vsel %vm1486_vm1, %v2658_v43, 0.0  ;;  %v2691_v12 = vld [vmem:[%s2536_s8 + $0xf8] sm:$0xff]  ;;  %v2694_v13 = vld [vmem:[%s2536_s8 + $0xf0] sm:$0xff]  ;;  %v2697_v14 = vld [vmem:[%s2536_s8 + $0x120] sm:$0xff] }
  0x7a   : > { %v1499_v38 = vadd.f32 %v1498_v2, %v1497_v26  ;;  %v1537_v41 = vadd.f32 %v1536_v23, %v1535_v28  ;;  %v1554_v42 = vadd.f32 %v1553_v37, %v1552_v30  ;;  %v1572_v51 = vsel %vm1486_vm1, %v2661_v46, 0.0  ;;  %v2708_v27 = vld [vmem:[%s2536_s8 + $0x128] sm:$0xff] }
  0x7b   : > { %v1571_v52 = vsel %vm1486_vm1, %v2664_v47, 0.0  ;;  %v1520_v54 = vadd.f32 %v1519_v21, %v1518_v39  ;;  %v1576_v2 = vsel %vm1486_vm1, %v2679_v61, 0.0  ;;  %v1563_v15 = vsel %vm1486_vm1, %v2691_v12, 0.0 }
  0x7c   : > { %1009 = vperm.xlu1 %2084, %v2562_v49   ;;  %1004 = vperm.xlu0 %2083, %v913_v60   ;;  %v1501_v53 = vadd.f32 %v1500_v59, %v1499_v38  ;;  %v1539_v55 = vadd.f32 %v1538_v33, %v1537_v41  ;;  %v2676_v49 = vld [vmem:[%s2536_s8 + $0xe8] sm:$0xff]  ;;  %v1556_v60 = vadd.f32 %v1555_v36, %v1554_v42  ;;  %v1574_v59 = vsel %vm1486_vm1, %v2682_v63, 0.0  ;;  %v2726_v42 = vld [vmem:[%s2536_s8 + $0x180] sm:$0xff] }
  0x7d   : > { %v1559_v0 = vsel %vm1486_vm1, %v2676_v49, 0.0  ;;  %v1573_v1 = vadd.f32 %v1572_v51, %v1571_v52  ;;  %v1522_v5 = vadd.f32 %v1521_v16, %v1520_v54  ;;  %v1561_v16 = vsel %vm1486_vm1, %v2694_v13, 0.0  ;;  %v2723_v41 = vld [vmem:[%s2536_s8 + $0x188] sm:$0xff]  ;;  %v2734_v51 = vld [vmem:[%s2536_s8 + $0x130] sm:$0xff] }
  0x7e   : > { %v1502_v3 = vrot.slane %v1501_v53, 4  ;;  %v1541_v8 = vadd.f32 %v1540_v48, %v1539_v55  ;;  %v1558_v9 = vadd.f32 %v1557_v50, %v1556_v60  ;;  %v1578_v21 = vsel %vm1486_vm1, %v2697_v14, 0.0  ;;  %v2731_v50 = vld [vmem:[%s2536_s8 + $0x138] sm:$0xff]  ;;  %v2745_v60 = vld [vmem:[%s2536_s8 + $0x150] sm:$0xff] }
  0x7f   : > { %v1575_v17 = vadd.f32 %v1574_v59, %v1573_v1  ;;  %v1523_v24 = vrot.slane %v1522_v5, 4  ;;  %v1580_v28 = vsel %vm1486_vm1, %v2708_v27, 0.0  ;;  %v1613_v54 = vsel %vm1486_vm1, %v2726_v42, 0.0  ;;  %v2748_v59 = vld [vmem:[%s2536_s8 + $0x1c0] sm:$0xff] }
  0x80   : > { %1019 = vperm.xlu1 %2084, %v2547_v40   ;;  %1014 = vperm.xlu0 %2083, %v2553_v44   ;;  %v1503_v23 = vadd.f32 %v1502_v3, %v1501_v53  ;;  %v1543_v25 = vadd.f32 %v1542_v34, %v1541_v8  ;;  %v1560_v26 = vadd.f32 %v1559_v0, %v1558_v9  ;;  %v2711_v40 = vld [vmem:[%s2536_s8 + $0x148] sm:$0xff]  ;;  %v2714_v44 = vld [vmem:[%s2536_s8 + $0x140] sm:$0xff]  ;;  %v1614_v53 = vsel %vm1486_vm1, %v2723_v41, 0.0 }
  0x81   : > { %v1577_v30 = vadd.f32 %v1576_v2, %v1575_v17  ;;  %v1593_v33 = vsel %vm1486_vm1, %v2711_v40, 0.0  ;;  %v1592_v36 = vsel %vm1486_vm1, %v2714_v44, 0.0  ;;  %v1524_v37 = vadd.f32 %v1523_v24, %v1522_v5  ;;  %v2758_v17 = vld [vmem:[%s2536_s8 + $0x1c8] sm:$0xff] }
  0x82   : > { %v1504_v34 = vrot.slane %v1503_v23, 2  ;;  %v1544_v38 = vrot.slane %v1543_v25, 4  ;;  %v1562_v39 = vadd.f32 %v1561_v16, %v1560_v26  ;;  %v1594_v52 = vadd.f32 %v1593_v33, %v1592_v36  ;;  %v2755_v16 = vld [vmem:[%s2536_s8 + $0x190] sm:$0xff] }
  0x83   : > { %v1579_v48 = vadd.f32 %v1578_v21, %v1577_v30  ;;  %v1615_v2 = vadd.f32 %v1614_v53, %v1613_v54  ;;  %v1595_v3 = vsel %vm1486_vm1, %v2745_v60, 0.0  ;;  %v1525_v5 = vrot.slane %v1524_v37, 2 }
  0x84   : > { %1029 = vperm.xlu1 %2084, %v2571_v56   ;;  %1024 = vperm.xlu0 %2083, %v2556_v45   ;;  %v1564_v55 = vadd.f32 %v1563_v15, %v1562_v39  ;;  %v1584_v56 = vsel %vm1486_vm1, %v2731_v50, 0.0  ;;  %v1582_v45 = vsel %vm1486_vm1, %v2734_v51, 0.0  ;;  %v1505_v0 = vadd.f32 %v1504_v34, %v1503_v23 }
  0x85   : > { %v1581_v1 = vadd.f32 %v1580_v28, %v1579_v48  ;;  %v1545_v8 = vadd.f32 %v1544_v38, %v1543_v25  ;;  %v1634_v15 = vsel %vm1486_vm1, %v2748_v59, 0.0  ;;  %v1596_v23 = vadd.f32 %v1595_v3, %v1594_v52  ;;  %v2767_v28 = vld [vmem:[%s2536_s8 + $0x1d0] sm:$0xff]  ;;  %v2777_v52 = vld [vmem:[%s2536_s8 + $0x160] sm:$0xff] }
  0x86   : > { %v1565_v9 = vrot.slane %v1564_v55, 4  ;;  %v1616_v24 = vsel %vm1486_vm1, %v2755_v16, 0.0  ;;  %v1635_v25 = vsel %vm1486_vm1, %v2758_v17, 0.0  ;;  %v1506_v34 = vrot.slane %v1505_v0, 1 }
  0x87   : > { %v1583_v21 = vadd.f32 %v1582_v45, %v1581_v1  ;;  %v1617_v33 = vadd.f32 %v1616_v24, %v1615_v2  ;;  %v1636_v36 = vadd.f32 %v1635_v25, %v1634_v15  ;;  %v1526_v38 = vadd.f32 %v1525_v5, %v1524_v37  ;;  %v2784_v37 = vld [vmem:[%s2536_s8 + $0x198] sm:$0xff]  ;;  %v2789_v2 = vld [vmem:[%s2536_s8 + $0x1a0] sm:$0xff] }
  0x88   : > { %1039 = vperm.xlu1 %2084, %v2585_v62   ;;  %1034 = vperm.xlu0 %2083, %v2593_v4   ;;  %v1566_v26 = vadd.f32 %v1565_v9, %v1564_v55  ;;  %v1637_v62 = vsel %vm1486_vm1, %v2767_v28, 0.0  ;;  %v2772_v4 = vld [vmem:[%s2536_s8 + $0x158] sm:$0xff]  ;;  %v1546_v39 = vrot.slane %v1545_v8, 2  ;;  %v1618_v1 = vsel %vm1486_vm1, %v2784_v37, 0.0  ;;  %v2797_v15 = vld [vmem:[%s2536_s8 + $0x1e0] sm:$0xff] }
  0x89   : > { %v1585_v30 = vadd.f32 %v1584_v56, %v1583_v21  ;;  %v1597_v48 = vsel %vm1486_vm1, %v2772_v4, 0.0  ;;  %v1638_v54 = vadd.f32 %v1637_v62, %v1636_v36  ;;  %v1599_v56 = vsel %vm1486_vm1, %v2777_v52, 0.0  ;;  %v2794_v9 = vld [vmem:[%s2536_s8 + $0x1d8] sm:$0xff] }
  0x8a   : > { %v1598_v55 = vadd.f32 %v1597_v48, %v1596_v23  ;;  %v1567_v45 = vrot.slane %v1566_v26, 2  ;;  %v1507_v21 = vadd.f32 %v1506_v34, %v1505_v0  ;;  %v1547_v23 = vadd.f32 %v1546_v39, %v1545_v8  ;;  %v2811_v8 = vld [vmem:[%s2536_s8 + $0x170] sm:$0xff]  ;;  %v2814_v34 = vld [vmem:[%s2536_s8 + $0x1a8] sm:$0xff] }
  0x8b   : > { %v1586_v53 = vrot.slane %v1585_v30, 4  ;;  %v1639_v24 = vsel %vm1486_vm1, %v2794_v9, 0.0  ;;  %v1641_v25 = vsel %vm1486_vm1, %v2797_v15, 0.0  ;;  %3058 = vst [vmem:[#allocation9_spill] sm:$0xff] %v2814_v34  ;;  %vm1470_vm3 = vcmask 1042434  }
  0x8c   : > { %1049 = vperm.xlu1 %2084, %v2606_v10   ;;  %1044 = vperm.xlu0 %2083, %v2609_v11   ;;  %v1600_v5 = vadd.f32 %v1599_v56, %v1598_v55  ;;  %v1619_v10 = vadd.f32 %v1618_v1, %v1617_v33  ;;  %v1620_v11 = vsel %vm1486_vm1, %v2789_v2, 0.0  ;;  %v1527_v33 = vrot.slane %v1526_v38, 1  ;;  %v2821_v55 = vld [vmem:[%s2536_s8 + $0x1b0] sm:$0xff] }
  0x8d   : > { %v1587_v3 = vadd.f32 %v1586_v53, %v1585_v30  ;;  %v2804_v30 = vld [vmem:[%s2536_s8 + $0x168] sm:$0xff]  ;;  %v1640_v62 = vadd.f32 %v1639_v24, %v1638_v54  ;;  %v1603_v53 = vsel %vm1486_vm1, %v2811_v8, 0.0  ;;  %v1624_v1 = vsel %vm1486_vm1, %v2821_v55, 0.0 }
  0x8e   : > { %v1621_v36 = vadd.f32 %v1620_v11, %v1619_v10  ;;  %v1601_v0 = vsel %vm1486_vm1, %v2804_v30, 0.0  ;;  %v2826_v10 = vld [vmem:[%s2536_s8 + $0x1e8] sm:$0xff]  ;;  %v2829_v11 = vld [vmem:[%s2536_s8 + $0x1f0] sm:$0xff]  ;;  %vm1472_vm4 = vcmask 1043459   ;;  %vm1474_vm5 = vcmask 1044484  }
  0x8f   : > { %v1588_v39 = vrot.slane %v1587_v3, 2  ;;  %v1602_v48 = vadd.f32 %v1601_v0, %v1600_v5  ;;  %v1642_v54 = vadd.f32 %v1641_v25, %v1640_v62  ;;  %3059 = vst [vmem:[#allocation10_spill] sm:$0xff] %v2826_v10  ;;  %3060 = vst [vmem:[#allocation11_spill] sm:$0xff] %v2829_v11  ;;  %v1548_v5 = vrot.slane %v1547_v23, 1  ;;  %v2841_v62 = vld [vmem:[%s2536_s8 + $0x1f8] sm:$0xff] }
  0x90   : > { %1059 = vperm.xlu1 %2084, %v2574_v57   ;;  %1054 = vperm.xlu0 %2083, %v2577_v58   ;;  %v1622_v57 = vsel %vm1486_vm1, %v2814_v34, 0.0  ;;  %v1568_v58 = vadd.f32 %v1567_v45, %v1566_v26  ;;  %v1643_v0 = vsel %vm1486_vm1, %v2826_v10, 0.0  ;;  %v1645_v34 = vsel %vm1486_vm1, %v2829_v11, 0.0 }
  0x91   : > { %v1623_v56 = vadd.f32 %v1622_v57, %v1621_v36  ;;  %v1604_v24 = vadd.f32 %v1603_v53, %v1602_v48  ;;  %v1528_v26 = vadd.f32 %v1527_v33, %v1526_v38  ;;  %v1644_v25 = vadd.f32 %v1643_v0, %v1642_v54  ;;  %v2838_v36 = vld [vmem:[%s2536_s8 + $0x178] sm:$0xff] }
  0x92   : > { %v1589_v57 = vadd.f32 %v1588_v39, %v1587_v3  ;;  %v1605_v48 = vsel %vm1486_vm1, %v2838_v36, 0.0  ;;  %v1647_v53 = vsel %vm1486_vm1, %v2841_v62, 0.0  ;;  %v1569_v10 = vrot.slane %v1568_v58, 1  ;;  %v2848_v33 = vld [vmem:[%s2536_s8 + $0x1b8] sm:$0xff] }
  0x93   : > { %v1625_v45 = vadd.f32 %v1624_v1, %v1623_v56  ;;  %v1646_v11 = vadd.f32 %v1645_v34, %v1644_v25  ;;  %v1606_v38 = vadd.f32 %v1605_v48, %v1604_v24  ;;  %v1663_v54 = vsel %vm1468_vm2, %v1528_v26, %v1507_v21 }
  0x94   : > { %1069 = vperm.xlu1 %2084, %v2596_v6   ;;  %1064 = vperm.xlu0 %2083, %v2599_v7   ;;  %v1549_v6 = vadd.f32 %v1548_v5, %v1547_v23  ;;  %v1626_v7 = vsel %vm1486_vm1, %v2848_v33, 0.0  ;;  %v1590_v1 = vrot.slane %v1589_v57, 1  ;;  %v1570_v34 = vadd.f32 %v1569_v10, %v1568_v58 }
  0x95   : > { %v1607_v3 = vrot.slane %v1606_v38, 4  ;;  %v1648_v39 = vadd.f32 %v1647_v53, %v1646_v11  ;;  %v1627_v56 = vadd.f32 %v1626_v7, %v1625_v45  ;;  %vm1476_vm6 = vcmask 1045509   ;;  %v1485_v7 = vld [vmem:[#allocation3] sm:$0xff] }
  0x96   : > { %v1664_v23 = vsel %vm1470_vm3, %v1549_v6, %v1663_v54  ;;  %vm1478_vm7 = vcmask 1046534   ;;  %vm1480_vm8 = vcmask 1047559  }
  0x97   : > { %v1608_v24 = vadd.f32 %v1607_v3, %v1606_v38  ;;  %v1649_v0 = vrot.slane %v1648_v39, 4  ;;  %v1628_v25 = vrot.slane %v1627_v56, 4  ;;  %v1665_v11 = vsel %vm1472_vm4, %v1570_v34, %v1664_v23 }
  0x98   : > { %1079 = vperm.xlu1 %2084, %v2629_v22   ;;  %1074 = vperm.xlu0 %2083, %v2618_v18   ;;  %v1591_v18 = vadd.f32 %v1590_v1, %v1589_v57  ;;  %v1966_v1 = vld [vmem:[%s2534_s7 + $0x28] sm:$0xff]  }
  0x99   : > { %v1609_v21 = vrot.slane %v1608_v24, 2  ;;  %v1650_v5 = vadd.f32 %v1649_v0, %v1648_v39  ;;  %v1629_v22 = vadd.f32 %v1628_v25, %v1627_v56  ;;  %v1856_v23 = vunpack.c.l.bf16 %v1966_v1 }
  0x9b   : > { %v1610_v26 = vadd.f32 %v1609_v21, %v1608_v24  ;;  %v1651_v45 = vrot.slane %v1650_v5, 2  ;;  %v1630_v48 = vrot.slane %v1629_v22, 2 }
  0x9c   : > { %1089 = vperm.xlu1 %2084, %v2638_v29   ;;  %1084 = vperm.xlu0 %2083, %v2651_v35   ;;  %v1666_v35 = vsel %vm1474_vm5, %v1591_v18, %v1665_v11  ;;  %v1967_v11 = vld [vmem:[%s2534_s7 + $0x30] sm:$0xff]  }
  0x9d   : > { %v1611_v58 = vrot.slane %v1610_v26, 1  ;;  %v1652_v10 = vadd.f32 %v1651_v45, %v1650_v5  ;;  %v1631_v29 = vadd.f32 %v1630_v48, %v1629_v22  ;;  %v1857_v48 = vunpack.c.h.bf16 %v1966_v1 }
  0x9f   : > { %v1612_v53 = vadd.f32 %v1611_v58, %v1610_v26  ;;  %v1653_v38 = vrot.slane %v1652_v10, 1  ;;  %v1632_v6 = vrot.slane %v1631_v29, 1 }
  0xa0   : > { %1099 = vperm.xlu1 %2084, %v2621_v19   ;;  %1094 = vperm.xlu0 %2083, %v2624_v20  }
  0xa1   : > { %v1667_v57 = vsel %vm1476_vm6, %v1612_v53, %v1666_v35  ;;  %v1654_v19 = vadd.f32 %v1653_v38, %v1652_v10  ;;  %v1633_v20 = vadd.f32 %v1632_v6, %v1631_v29  ;;  %v1860_v35 = vunpack.c.l.bf16 %v1967_v11  ;;  %v1968_v53 = vld [vmem:[%s2534_s7 + $0x38] sm:$0xff]  }
  0xa3   : > { %v1668_v54 = vsel %vm1478_vm7, %v1633_v20, %v1667_v57  ;;  %v1861_v57 = vunpack.c.h.bf16 %v1967_v11 }
  0xa4   : > { %1109 = vperm.xlu1 %2084, %v2641_v31   ;;  %1104 = vperm.xlu0 %2083, %v2644_v32   ;;  %v1669_v3 = vsel %vm1480_vm8, %v1654_v19, %v1668_v54  ;;  %v3061_v31 = vld [vmem:[#allocation9_spill] sm:$0xff]  ;;  %v3062_v32 = vld [vmem:[#allocation10_spill] sm:$0xff] }
  0xa5   : > { %v1671_v39 = vadd.f32 %v1669_v3, %v1485_v7 }
  0xa7   : > { %1672 = vst.msk [vmem:[#allocation3] sm:$0xff] %vm1486_vm1, %v1671_v39  ;;  %v1864_v39 = vunpack.c.l.bf16 %v1968_v53 }
  0xa8   : > { %1119 = vperm.xlu1 %2084, %v2676_v49   ;;  %1114 = vperm.xlu0 %2083, %v2658_v43   ;;  %v3063_v43 = vld [vmem:[#allocation11_spill] sm:$0xff]  ;;  %v1962_v49 = vld [vmem:[%s2534_s7 + $0x8] sm:$0xff]  }
  0xac   : > { %1129 = vperm.xlu1 %2084, %v2691_v12   ;;  %1124 = vperm.xlu0 %2083, %v2694_v13   ;;  %v1840_v13 = vunpack.c.l.bf16 %v1962_v49 }
  0xb0   : > { %1139 = vperm.xlu1 %2084, %v2661_v46   ;;  %1134 = vperm.xlu0 %2083, %v2664_v47   ;;  %v1835_v46 = vld [vmem:[%s2534_s7] sm:$0xff]  }
  0xb1   : > { %v1837_v12 = vunpack.c.h.bf16 %v1835_v46 }
  0xb4   : > { %1149 = vperm.xlu1 %2084, %v2679_v61   ;;  %1144 = vperm.xlu0 %2083, %v2682_v63   ;;  %v1836_v63 = vunpack.c.l.bf16 %v1835_v46  ;;  %v1865_v46 = vunpack.c.h.bf16 %v1968_v53 }
  0xb8   : > { %1159 = vperm.xlu1 %2084, %v2708_v27   ;;  %1154 = vperm.xlu0 %2083, %v2697_v14  }
  0xbc   : > { %1169 = vperm.xlu1 %2084, %v2731_v50   ;;  %1164 = vperm.xlu0 %2083, %v2734_v51  }
  0xc0   : > { %1179 = vperm.xlu1 %2084, %v2711_v40   ;;  %1174 = vperm.xlu0 %2083, %v2714_v44   ;;  %v1963_v40 = vld [vmem:[%s2534_s7 + $0x10] sm:$0xff]  }
  0xc4   : > { %1219 = vperm.xlu1 %2084, %v2723_v41   ;;  %1214 = vperm.xlu0 %2083, %v2726_v42   ;;  %v1841_v41 = vunpack.c.h.bf16 %v1962_v49 }
  0xc8   : > { %1254 = vperm.xlu1 %2084, %v2748_v59   ;;  %1184 = vperm.xlu0 %2083, %v2745_v60   ;;  %v1844_v60 = vunpack.c.l.bf16 %v1963_v40 }
  0xcc   : > { %1224 = vperm.xlu1 %2084, %v2755_v16   ;;  %1259 = vperm.xlu0 %2083, %v2758_v17   ;;  %v1964_v17 = vld [vmem:[%s2534_s7 + $0x18] sm:$0xff]  }
  0xd0   : > { %1264 = vperm.xlu1 %2084, %v2767_v28   ;;  %1189 = vperm.xlu0 %2083, %v2772_v4  }
  0xd4   : > { %1194 = vperm.xlu1 %2084, %v2777_v52   ;;  %1229 = vperm.xlu0 %2083, %v2784_v37   ;;  %v1845_v52 = vunpack.c.h.bf16 %v1963_v40  ;;  %v1965_v37 = vld [vmem:[%s2534_s7 + $0x20] sm:$0xff]  }
  0xd5   : > { %v1852_v56 = vunpack.c.l.bf16 %v1965_v37 }
  0xd8   : > { %1234 = vperm.xlu1 %2084, %v2789_v2   ;;  %1269 = vperm.xlu0 %2083, %v2794_v9  }
  0xdc   : > { %1274 = vperm.xlu1 %2084, %v2797_v15   ;;  %1199 = vperm.xlu0 %2083, %v2804_v30   ;;  %v1848_v15 = vunpack.c.l.bf16 %v1964_v17 }
  0xe0   : > { %1204 = vperm.xlu1 %2084, %v2811_v8   ;;  %1239 = vperm.xlu0 %2083, %v3061_v31   ;;  %v1849_v8 = vunpack.c.h.bf16 %v1964_v17  ;;  %v1969_v31 = vld [vmem:[%s2534_s7 + $0x40] sm:$0xff]   ;;  %v1971_v17 = vld [vmem:[%s2534_s7 + $0x50] sm:$0xff]  }
  0xe4   : > { %1244 = vperm.xlu1 %2084, %v2821_v55   ;;  %1279 = vperm.xlu0 %2083, %v3062_v32  }
  0xe8   : > { %1284 = vperm.xlu1 %2084, %v3063_v43   ;;  %1209 = vperm.xlu0 %2083, %v2838_v36  }
  0xeb   : > { %v985_v47 = vpop.permute.xlu1 %984  ;;  %v975_v61 = vpop.permute.xlu0 %974 }
  0xec   : > { %1289 = vperm.xlu1 %2084, %v2841_v62   ;;  %1249 = vperm.xlu0 %2083, %v2848_v33   ;;  %v1292_v44 = vmul.f32 %v1836_v63, %v975_v61  ;;  %v1294_v50 = vmul.f32 %v1840_v13, %v985_v47  ;;  %v1853_v33 = vunpack.c.h.bf16 %v1965_v37  ;;  %v1869_v61 = vunpack.c.h.bf16 %v1969_v31 }
  0xef   : > { %v990_v14 = vpop.permute.xlu1 %989  ;;  %v980_v27 = vpop.permute.xlu0 %979 }
  0xf0   : > { %v1293_v42 = vmul.f32 %v1837_v12, %v980_v27  ;;  %v1295_v28 = vmul.f32 %v1841_v41, %v990_v14  ;;  %v1868_v14 = vunpack.c.l.bf16 %v1969_v31  ;;  %v1970_v27 = vld [vmem:[%s2534_s7 + $0x48] sm:$0xff]  }
  0xf2   : > { %v1356_v51 = vadd.f32 %v1293_v42, %v1292_v44 }
  0xf3   : > { %v1000_v59 = vpop.permute.xlu1 %999  ;;  %v995_v16 = vpop.permute.xlu0 %994 }
  0xf4   : > { %v1357_v4 = vadd.f32 %v1356_v51, %v1294_v50  ;;  %v1296_v2 = vmul.f32 %v1844_v60, %v995_v16  ;;  %v1297_v36 = vmul.f32 %v1845_v52, %v1000_v59  ;;  %v1872_v50 = vunpack.c.l.bf16 %v1970_v27 }
  0xf5   : > { %v1873_v52 = vunpack.c.h.bf16 %v1970_v27 }
  0xf6   : > { %v1358_v9 = vadd.f32 %v1357_v4, %v1295_v28 }
  0xf7   : > { %v1010_v30 = vpop.permute.xlu1 %1009  ;;  %v1005_v55 = vpop.permute.xlu0 %1004 }
  0xf8   : > { %v1359_v62 = vadd.f32 %v1358_v9, %v1296_v2  ;;  %v1298_v34 = vmul.f32 %v1848_v15, %v1005_v55  ;;  %v1299_v21 = vmul.f32 %v1849_v8, %v1010_v30  ;;  %v1876_v8 = vunpack.c.l.bf16 %v1971_v17  ;;  %v1972_v55 = vld [vmem:[%s2534_s7 + $0x58] sm:$0xff]  }
  0xf9   : > { %v1881_v11 = vunpack.c.h.bf16 %v1972_v55 }
  0xfa   : > { %v1360_v24 = vadd.f32 %v1359_v62, %v1297_v36 }
  0xfb   : > { %v1020_v0 = vpop.permute.xlu1 %1019  ;;  %v1015_v25 = vpop.permute.xlu0 %1014 }
  0xfc   : > { %v1361_v5 = vadd.f32 %v1360_v24, %v1298_v34  ;;  %v1301_v22 = vmul.f32 %v1853_v33, %v1020_v0  ;;  %v1300_v18 = vmul.f32 %v1852_v56, %v1015_v25  ;;  %v1877_v56 = vunpack.c.h.bf16 %v1971_v17 }
  0xfd   : > { %v1880_v24 = vunpack.c.l.bf16 %v1972_v55 }
  0xfe   : > { %v1362_v26 = vadd.f32 %v1361_v5, %v1299_v21  ;;  %v1369_v45 = vadd.f32 %v1301_v22, %v1300_v18 }
  0xff   : > { %v1030_v58 = vpop.permute.xlu1 %1029  ;;  %v1025_v10 = vpop.permute.xlu0 %1024 }
 0x100   : > { %v1302_v29 = vmul.f32 %v1856_v23, %v1025_v10  ;;  %v1303_v38 = vmul.f32 %v1857_v48, %v1030_v58  ;;  %v1363_v7 = vrot.slane %v1362_v26, 4 }
 0x102   : > { %v1370_v6 = vadd.f32 %v1369_v45, %v1302_v29  ;;  %v1364_v63 = vadd.f32 %v1363_v7, %v1362_v26 }
 0x103   : > { %v1040_v19 = vpop.permute.xlu1 %1039  ;;  %v1035_v20 = vpop.permute.xlu0 %1034 }
 0x104   : > { %v1304_v54 = vmul.f32 %v1860_v35, %v1035_v20  ;;  %v1371_v3 = vadd.f32 %v1370_v6, %v1303_v38  ;;  %v1305_v32 = vmul.f32 %v1861_v57, %v1040_v19  ;;  %v1365_v51 = vrot.slane %v1364_v63, 2 }
 0x106   : > { %v1372_v43 = vadd.f32 %v1371_v3, %v1304_v54  ;;  %v1366_v9 = vadd.f32 %v1365_v51, %v1364_v63  ;;  %v1977_v51 = vld [vmem:[%s2534_s7 + $0x80] sm:$0xff]  }
 0x107   : > { %v1050_v47 = vpop.permute.xlu1 %1049  ;;  %v1045_v49 = vpop.permute.xlu0 %1044 }
 0x108   : > { %v1306_v12 = vmul.f32 %v1864_v39, %v1045_v49  ;;  %v1373_v13 = vadd.f32 %v1372_v43, %v1305_v32  ;;  %v1307_v40 = vmul.f32 %v1865_v46, %v1050_v47  ;;  %v1367_v0 = vrot.slane %v1366_v9, 1 }
 0x10a   : > { %v1374_v44 = vadd.f32 %v1373_v13, %v1306_v12  ;;  %v1368_v48 = vadd.f32 %v1367_v0, %v1366_v9 }
 0x10b   : > { %v1060_v41 = vpop.permute.xlu1 %1059  ;;  %v1055_v42 = vpop.permute.xlu0 %1054 }
 0x10c   : > { %v1375_v60 = vadd.f32 %v1374_v44, %v1307_v40  ;;  %v1309_v59 = vmul.f32 %v1869_v61, %v1060_v41  ;;  %v1308_v16 = vmul.f32 %v1868_v14, %v1055_v42 }
 0x10e   : > { %v1376_v28 = vrot.slane %v1375_v60, 4  ;;  %v1382_v4 = vadd.f32 %v1309_v59, %v1308_v16  ;;  %v1978_v59 = vld [vmem:[%s2534_s7 + $0x88] sm:$0xff]  }
 0x10f   : > { %v1070_v37 = vpop.permute.xlu1 %1069  ;;  %v1065_v2 = vpop.permute.xlu0 %1064  ;;  %v1904_v9 = vunpack.c.l.bf16 %v1978_v59 }
 0x110   : > { %v1377_v15 = vadd.f32 %v1376_v28, %v1375_v60  ;;  %v1310_v30 = vmul.f32 %v1872_v50, %v1065_v2  ;;  %v1311_v62 = vmul.f32 %v1873_v52, %v1070_v37  ;;  %v1973_v50 = vld [vmem:[%s2534_s7 + $0x60] sm:$0xff]   ;;  %v1974_v60 = vld [vmem:[%s2534_s7 + $0x68] sm:$0xff]   ;;  %v1901_v28 = vunpack.c.h.bf16 %v1977_v51 }
 0x111   : > { %v1885_v16 = vunpack.c.h.bf16 %v1973_v50  ;;  %v1884_v17 = vunpack.c.l.bf16 %v1973_v50  ;;  %v1888_v2 = vunpack.c.l.bf16 %v1974_v60  ;;  %v1889_v0 = vunpack.c.h.bf16 %v1974_v60 }
 0x112   : > { %v1378_v36 = vrot.slane %v1377_v15, 2  ;;  %v1383_v33 = vadd.f32 %v1382_v4, %v1310_v30  ;;  %v1900_v4 = vunpack.c.l.bf16 %v1977_v51 }
 0x113   : > { %v1080_v1 = vpop.permute.xlu1 %1079  ;;  %v1075_v34 = vpop.permute.xlu0 %1074 }
 0x114   : > { %v1379_v25 = vadd.f32 %v1378_v36, %v1377_v15  ;;  %v1312_v23 = vmul.f32 %v1876_v8, %v1075_v34  ;;  %v1384_v21 = vadd.f32 %v1383_v33, %v1311_v62  ;;  %v1313_v22 = vmul.f32 %v1877_v56, %v1080_v1  ;;  %v1975_v1 = vld [vmem:[%s2534_s7 + $0x70] sm:$0xff]  }
 0x115   : > { %v1979_v34 = vld [vmem:[%s2534_s7 + $0x90] sm:$0xff]  }
 0x116   : > { %v1380_v5 = vrot.slane %v1379_v25, 1  ;;  %v1385_v18 = vadd.f32 %v1384_v21, %v1312_v23  ;;  %v1905_v23 = vunpack.c.h.bf16 %v1978_v59  ;;  %v1989_v59 = vld [vmem:[%s2534_s7 + $0xe0] sm:$0xff]  }
 0x117   : > { %v1090_v26 = vpop.permute.xlu1 %1089  ;;  %v1085_v45 = vpop.permute.xlu0 %1084 }
 0x118   : > { %v1381_v58 = vadd.f32 %v1380_v5, %v1379_v25  ;;  %v1314_v10 = vmul.f32 %v1880_v24, %v1085_v45  ;;  %v1386_v29 = vadd.f32 %v1385_v18, %v1313_v22  ;;  %v1315_v53 = vmul.f32 %v1881_v11, %v1090_v26 }
 0x119   : > { %v1892_v18 = vunpack.c.l.bf16 %v1975_v1  ;;  %v1908_v26 = vunpack.c.l.bf16 %v1979_v34 }
 0x11a   : > { %v1469_v35 = vsel %vm1468_vm2, %v1381_v58, %v1368_v48  ;;  %v1387_v38 = vadd.f32 %v1386_v29, %v1314_v10 }
 0x11b   : > { %v1100_v6 = vpop.permute.xlu1 %1099  ;;  %v1095_v57 = vpop.permute.xlu0 %1094 }
 0x11c   : > { %v1388_v19 = vadd.f32 %v1387_v38, %v1315_v53  ;;  %v1317_v15 = vmul.f32 %v1885_v16, %v1100_v6  ;;  %v1316_v30 = vmul.f32 %v1884_v17, %v1095_v57  ;;  %v1976_v6 = vld [vmem:[%s2534_s7 + $0x78] sm:$0xff]   ;;  %v1982_v16 = vld [vmem:[%s2534_s7 + $0xa8] sm:$0xff]  }
 0x11d   : > { %v1980_v57 = vld [vmem:[%s2534_s7 + $0x98] sm:$0xff]   ;;  %v1986_v17 = vld [vmem:[%s2534_s7 + $0xc8] sm:$0xff]  }
 0x11e   : > { %v1389_v20 = vrot.slane %v1388_v19, 4  ;;  %v1395_v24 = vadd.f32 %v1317_v15, %v1316_v30  ;;  %v1983_v15 = vld [vmem:[%s2534_s7 + $0xb0] sm:$0xff]  }
 0x11f   : > { %v1110_v7 = vpop.permute.xlu1 %1109  ;;  %v1105_v54 = vpop.permute.xlu0 %1104 }
 0x120   : > { %v1390_v3 = vadd.f32 %v1389_v20, %v1388_v19  ;;  %v1318_v33 = vmul.f32 %v1888_v2, %v1105_v54  ;;  %v1319_v45 = vmul.f32 %v1889_v0, %v1110_v7  ;;  %v1893_v19 = vunpack.c.h.bf16 %v1975_v1  ;;  %v1990_v2 = vld [vmem:[%s2534_s7 + $0xe8] sm:$0xff]  }
 0x121   : > { %v1909_v20 = vunpack.c.h.bf16 %v1979_v34  ;;  %v1952_v0 = vunpack.c.l.bf16 %v1990_v2 }
 0x122   : > { %v1391_v39 = vrot.slane %v1390_v3, 2  ;;  %v1396_v22 = vadd.f32 %v1395_v24, %v1318_v33  ;;  %v1948_v33 = vunpack.c.l.bf16 %v1989_v59  ;;  %v1949_v24 = vunpack.c.h.bf16 %v1989_v59 }
 0x123   : > { %v2917_v31 = vpop.permute.xlu1 %1119  ;;  %v1115_v32 = vpop.permute.xlu0 %1114 }
 0x124   : > { %v1392_v43 = vadd.f32 %v1391_v39, %v1390_v3  ;;  %v1320_v29 = vmul.f32 %v1892_v18, %v1115_v32  ;;  %v1896_v39 = vunpack.c.l.bf16 %v1976_v6  ;;  %v1321_v32 = vmul.f32 %v1893_v19, %v2917_v31 }
 0x125   : > { %v1897_v31 = vunpack.c.h.bf16 %v1976_v6  ;;  %v1921_v18 = vunpack.c.h.bf16 %v1982_v16 }
 0x126   : > { %v1393_v46 = vrot.slane %v1392_v43, 1 }
 0x127   : > { %v2919_v47 = vpop.permute.xlu1 %1129  ;;  %v2921_v49 = vpop.permute.xlu0 %1124 }
 0x128   : > { %v1394_v61 = vadd.f32 %v1393_v46, %v1392_v43  ;;  %v1912_v46 = vunpack.c.l.bf16 %v1980_v57 }
 0x12a   : > { %v2924_v63 = vsel %vm1470_vm3, %v1394_v61, %v1469_v35  ;;  %v1397_v35 = vadd.f32 %v1396_v22, %v1319_v45 }
 0x12b   : > { %v1140_v12 = vpop.permute.xlu1 %1139  ;;  %v1135_v13 = vpop.permute.xlu0 %1134 }
 0x12c   : > { %v1325_v8 = vmul.f32 %v1901_v28, %v1140_v12  ;;  %v1324_v55 = vmul.f32 %v1900_v4, %v1135_v13  ;;  %v1398_v7 = vadd.f32 %v1397_v35, %v1320_v29  ;;  %v1981_v12 = vld [vmem:[%s2534_s7 + $0xa0] sm:$0xff]  }
 0x12d   : > { %v1917_v28 = vunpack.c.h.bf16 %v1981_v12  ;;  %v1916_v4 = vunpack.c.l.bf16 %v1981_v12 }
 0x12e   : > { %v1408_v25 = vadd.f32 %v1325_v8, %v1324_v55  ;;  %v1399_v50 = vadd.f32 %v1398_v7, %v1321_v32  ;;  %v2974_v7 = vld [vmem:[%s2534_s7 + $0xd8] sm:$0xff]  }
 0x12f   : > { %v1150_v14 = vpop.permute.xlu1 %1149  ;;  %v1145_v27 = vpop.permute.xlu0 %1144 }
 0x130   : > { %v1326_v56 = vmul.f32 %v1904_v9, %v1145_v27  ;;  %v1327_v48 = vmul.f32 %v1905_v23, %v1150_v14  ;;  %v1985_v27 = vld [vmem:[%s2534_s7 + $0xc0] sm:$0xff]  }
 0x131   : > { %v1933_v9 = vunpack.c.h.bf16 %v1985_v27  ;;  %v1932_v55 = vunpack.c.l.bf16 %v1985_v27 }
 0x132   : > { %v1409_v11 = vadd.f32 %v1408_v25, %v1326_v56  ;;  %v1936_v56 = vunpack.c.l.bf16 %v1986_v17  ;;  %v1991_v25 = vld [vmem:[%s2534_s7 + $0xf0] sm:$0xff]  }
 0x133   : > { %v1160_v40 = vpop.permute.xlu1 %1159  ;;  %v1155_v44 = vpop.permute.xlu0 %1154  ;;  %v1956_v19 = vunpack.c.l.bf16 %v1991_v25 }
 0x134   : > { %v1328_v53 = vmul.f32 %v1908_v26, %v1155_v44  ;;  %v1410_v38 = vadd.f32 %v1409_v11, %v1327_v48  ;;  %v1329_v61 = vmul.f32 %v1909_v20, %v1160_v40  ;;  %v1322_v44 = vmul.f32 %v1896_v39, %v2921_v49 }
 0x135   : > { %v1913_v40 = vunpack.c.h.bf16 %v1980_v57  ;;  %v1920_v49 = vunpack.c.l.bf16 %v1982_v16  ;;  %v1924_v11 = vunpack.c.l.bf16 %v1983_v15  ;;  %v1323_v26 = vmul.f32 %v1897_v31, %v2919_v47 }
 0x136   : > { %v1411_v43 = vadd.f32 %v1410_v38, %v1328_v53  ;;  %v1400_v1 = vadd.f32 %v1399_v50, %v1322_v44  ;;  %v1937_v48 = vunpack.c.h.bf16 %v1986_v17  ;;  %v1984_v38 = vld [vmem:[%s2534_s7 + $0xb8] sm:$0xff]   ;;  %v1953_v57 = vunpack.c.h.bf16 %v1990_v2 }
 0x137   : > { %v2926_v41 = vpop.permute.xlu1 %1169  ;;  %v1165_v42 = vpop.permute.xlu0 %1164  ;;  %v1925_v20 = vunpack.c.h.bf16 %v1983_v15  ;;  %v1928_v32 = vunpack.c.l.bf16 %v1984_v38  ;;  %v1944_v44 = vunpack.c.l.bf16 %v2974_v7  ;;  %v1957_v50 = vunpack.c.h.bf16 %v1991_v25 }
 0x138   : > { %v1330_v51 = vmul.f32 %v1912_v46, %v1165_v42  ;;  %v1412_v60 = vadd.f32 %v1411_v43, %v1329_v61  ;;  %v1987_v42 = vld [vmem:[%s2534_s7 + $0xd0] sm:$0xff]   ;;  %v1331_v45 = vmul.f32 %v1913_v40, %v2926_v41 }
 0x139   : > { %v1940_v29 = vunpack.c.l.bf16 %v1987_v42  ;;  %v1941_v27 = vunpack.c.h.bf16 %v1987_v42 }
 0x13a   : > { %v1413_v34 = vadd.f32 %v1412_v60, %v1330_v51 }
 0x13b   : > { %v2932_v52 = vpop.permute.xlu1 %1179  ;;  %v2934_v37 = vpop.permute.xlu0 %1174 }
 0x13c   : > { %v1333_v23 = vmul.f32 %v1917_v28, %v2932_v52  ;;  %v1332_v22 = vmul.f32 %v1916_v4, %v2934_v37  ;;  %v1401_v52 = vadd.f32 %v1400_v1, %v1323_v26  ;;  %v1414_v37 = vadd.f32 %v1413_v34, %v1331_v45 }
 0x13e   : > { %v1421_v41 = vadd.f32 %v1333_v23, %v1332_v22  ;;  %v1402_v16 = vrot.slane %v1401_v52, 4  ;;  %v1415_v17 = vrot.slane %v1414_v37, 4 }
 0x13f   : > { %v2936_v36 = vpop.permute.xlu1 %1219  ;;  %v2938_v62 = vpop.permute.xlu0 %1214 }
 0x140   : > { %v1341_v39 = vmul.f32 %v1933_v9, %v2936_v36  ;;  %v1340_v47 = vmul.f32 %v1932_v55, %v2938_v62  ;;  %v1992_v62 = vld [vmem:[%s2534_s7 + $0xf8] sm:$0xff]   ;;  %v1416_v34 = vadd.f32 %v1415_v17, %v1414_v37 }
 0x141   : > { %v1960_v55 = vunpack.c.l.bf16 %v1992_v62 }
 0x143   : > { %v2942_v21 = vpop.permute.xlu1 %1254  ;;  %v2944_v5 = vpop.permute.xlu0 %1184 }
 0x144   : > { %v1334_v6 = vmul.f32 %v1920_v49, %v2944_v5  ;;  %v1348_v51 = vmul.f32 %v1948_v33, %v2942_v21  ;;  %v1929_v21 = vunpack.c.h.bf16 %v1984_v38 }
 0x146   : > { %v1422_v60 = vadd.f32 %v1421_v41, %v1334_v6 }
 0x147   : > { %v2946_v58 = vpop.permute.xlu1 %1224  ;;  %v2948_v10 = vpop.permute.xlu0 %1259 }
 0x148   : > { %v1349_v43 = vmul.f32 %v1949_v24, %v2948_v10  ;;  %v1342_v61 = vmul.f32 %v1936_v56, %v2946_v58  ;;  %v1434_v10 = vadd.f32 %v1341_v39, %v1340_v47  ;;  %v1403_v56 = vadd.f32 %v1402_v16, %v1401_v52 }
 0x14a   : > { %v1447_v28 = vadd.f32 %v1349_v43, %v1348_v51  ;;  %v1435_v31 = vadd.f32 %v1434_v10, %v1342_v61 }
 0x14b   : > { %v2952_v54 = vpop.permute.xlu1 %1264  ;;  %v1190_v3 = vpop.permute.xlu0 %1189 }
 0x14c   : > { %v1335_v46 = vmul.f32 %v1921_v18, %v1190_v3  ;;  %v1350_v36 = vmul.f32 %v1952_v0, %v2952_v54  ;;  %v1945_v18 = vunpack.c.h.bf16 %v2974_v7 }
 0x14e   : > { %v1423_v58 = vadd.f32 %v1422_v60, %v1335_v46  ;;  %v1448_v33 = vadd.f32 %v1447_v28, %v1350_v36 }
 0x14f   : > { %v1195_v13 = vpop.permute.xlu1 %1194  ;;  %v2956_v14 = vpop.permute.xlu0 %1229 }
 0x150   : > { %v1336_v59 = vmul.f32 %v1924_v11, %v1195_v13  ;;  %v1343_v3 = vmul.f32 %v1937_v48, %v2956_v14 }
 0x152   : > { %v1424_v49 = vadd.f32 %v1423_v58, %v1336_v59  ;;  %v1436_v42 = vadd.f32 %v1435_v31, %v1343_v3 }
 0x153   : > { %v1235_v30 = vpop.permute.xlu1 %1234  ;;  %v1270_v8 = vpop.permute.xlu0 %1269 }
 0x154   : > { %v1351_v4 = vmul.f32 %v1953_v57, %v1270_v8  ;;  %v1344_v40 = vmul.f32 %v1940_v29, %v1235_v30  ;;  %v1961_v30 = vunpack.c.h.bf16 %v1992_v62  ;;  %v1404_v29 = vrot.slane %v1403_v56, 2 }
 0x156   : > { %v1449_v24 = vadd.f32 %v1448_v33, %v1351_v4  ;;  %v1437_v25 = vadd.f32 %v1436_v42, %v1344_v40  ;;  %v1405_v41 = vadd.f32 %v1404_v29, %v1403_v56 }
 0x157   : > { %v1275_v35 = vpop.permute.xlu1 %1274  ;;  %v1200_v53 = vpop.permute.xlu0 %1199 }
 0x158   : > { %v1337_v2 = vmul.f32 %v1925_v20, %v1200_v53  ;;  %v1352_v54 = vmul.f32 %v1956_v19, %v1275_v35  ;;  %v1417_v53 = vrot.slane %v1416_v34, 2 }
 0x15a   : > { %v1425_v14 = vadd.f32 %v1424_v49, %v1337_v2  ;;  %v1450_v11 = vadd.f32 %v1449_v24, %v1352_v54  ;;  %v1418_v43 = vadd.f32 %v1417_v53, %v1416_v34 }
 0x15b   : > { %v1205_v5 = vpop.permute.xlu1 %1204  ;;  %v1240_v12 = vpop.permute.xlu0 %1239 }
 0x15c   : > { %v1338_v13 = vmul.f32 %v1928_v32, %v1205_v5  ;;  %v1345_v1 = vmul.f32 %v1941_v27, %v1240_v12  ;;  %v1406_v27 = vrot.slane %v1405_v41, 1 }
 0x15e   : > { %v1426_v26 = vadd.f32 %v1425_v14, %v1338_v13  ;;  %v1438_v35 = vadd.f32 %v1437_v25, %v1345_v1  ;;  %v1407_v16 = vadd.f32 %v1406_v27, %v1405_v41 }
 0x15f   : > { %v1245_v9 = vpop.permute.xlu1 %1244  ;;  %v1280_v15 = vpop.permute.xlu0 %1279 }
 0x160   : > { %v1353_v0 = vmul.f32 %v1957_v50, %v1280_v15  ;;  %v1346_v8 = vmul.f32 %v1944_v44, %v1245_v9  ;;  %v1419_v44 = vrot.slane %v1418_v43, 1  ;;  %v1473_v2 = vsel %vm1472_vm4, %v1407_v16, %v2924_v63 }
 0x162   : > { %v1451_v38 = vadd.f32 %v1450_v11, %v1353_v0  ;;  %v1439_v57 = vadd.f32 %v1438_v35, %v1346_v8  ;;  %v1420_v17 = vadd.f32 %v1419_v44, %v1418_v43 }
 0x163   : > { %v1285_v23 = vpop.permute.xlu1 %1284  ;;  %v1210_v22 = vpop.permute.xlu0 %1209 }
 0x164   : > { %v1354_v45 = vmul.f32 %v1960_v55, %v1285_v23  ;;  %v1339_v48 = vmul.f32 %v1929_v21, %v1210_v22  ;;  %v1475_v31 = vsel %vm1474_vm5, %v1420_v17, %v1473_v2  ;;  %v971_v55 = vld [vmem:[#allocation2] sm:$0xff] }
 0x166   : > { %v1427_v6 = vadd.f32 %v1426_v26, %v1339_v48  ;;  %v1452_v52 = vadd.f32 %v1451_v38, %v1354_v45 }
 0x167   : > { %v1290_v19 = vpop.permute.xlu1 %1289  ;;  %v1250_v20 = vpop.permute.xlu0 %1249 }
 0x168   : > { %v1428_v37 = vrot.slane %v1427_v6, 4  ;;  %v1355_v39 = vmul.f32 %v1961_v30, %v1290_v19  ;;  %v1347_v47 = vmul.f32 %v1945_v18, %v1250_v20 }
 0x16a   : > { %v1429_v46 = vadd.f32 %v1428_v37, %v1427_v6  ;;  %v1453_v7 = vadd.f32 %v1452_v52, %v1355_v39  ;;  %v1440_v32 = vadd.f32 %v1439_v57, %v1347_v47 }
 0x16c   : > { %v1430_v61 = vrot.slane %v1429_v46, 2  ;;  %v1454_v5 = vrot.slane %v1453_v7, 4  ;;  %v1441_v12 = vrot.slane %v1440_v32, 4 }
 0x16e   : > { %v1431_v50 = vadd.f32 %v1430_v61, %v1429_v46  ;;  %v1455_v51 = vadd.f32 %v1454_v5, %v1453_v7  ;;  %v1442_v60 = vadd.f32 %v1441_v12, %v1440_v32 }
 0x170   : > { %v1432_v36 = vrot.slane %v1431_v50, 1  ;;  %v1456_v59 = vrot.slane %v1455_v51, 2  ;;  %v1443_v62 = vrot.slane %v1442_v60, 2 }
 0x172   : > { %v1457_v10 = vadd.f32 %v1456_v59, %v1455_v51  ;;  %v1444_v3 = vadd.f32 %v1443_v62, %v1442_v60  ;;  %v1433_v28 = vadd.f32 %v1432_v36, %v1431_v50 }
 0x174   : > { %v1458_v58 = vrot.slane %v1457_v10, 1  ;;  %v1445_v4 = vrot.slane %v1444_v3, 1  ;;  %v1477_v15 = vsel %vm1476_vm6, %v1433_v28, %v1475_v31 }
 0x176   : > { %v1459_v40 = vadd.f32 %v1458_v58, %v1457_v10  ;;  %v1446_v9 = vadd.f32 %v1445_v4, %v1444_v3 }
 0x178   : > { %v1479_v21 = vsel %vm1478_vm7, %v1446_v9, %v1477_v15  ;;  %1676 = sbr.rel (%p1827_p4) target bundleno = 683 (0x2ab), region = 115 }
 0x179   : > { %v1481_v33 = vsel %vm1480_vm8, %v1459_v40, %v1479_v21 }
 0x17a   : > { %v1483_v49 = vadd.f32 %v1481_v33, %v971_v55 }
 0x17c   : > { %1484 = vst [vmem:[#allocation2] sm:$0xff] %v1483_v49 }
 0x17d   : > { %v1677_v54 = vld [vmem:[#allocation3] sm:$0xff]  ;;  %v2202_v13 = vmov 0  }
 0x17e   : > { %2085 = vset.pattern.permute.xlu0 %v2202_v13  ;;  %v1678_v63 = vmax.f32 %v1677_v54, 1e-09 }
 0x180   : > { %2086 = vrcp.f32 %v1678_v63 }
 0x183   : > { %v1679_v42 = vld [vmem:[#allocation2] sm:$0xff] }
 0x18d   : > { %v2087_v56 = vpop.eup %2086 }
 0x18e   : > { %1683 = vperm.xlu0 %2085, %v2087_v56  }
 0x209   : > { %v1684_v1 = vpop.permute.xlu0 %1683 }
 0x20a   : > { %v1686_v34 = vmul.f32 %v1684_v1, %v1679_v42 }
 0x20c   : > { %v1687_v24 = vmul.f32 %v1686_v34, %v1686_v34 }
 0x20e   : > { %1688 = vadd.xlane.f32.xlu0 %v1687_v24 }
 0x297   : > { %v1689_v14 = vpop.xlane.xlu0 %1688 }
 0x298   : > { %v1690_v0 = vmax.f32 %v1689_v14, 1e-24 }
 0x29a   : > { %2088 = vrsqrt.f32 %v1690_v0 }
 0x2a7   : > { %v2089_v25 = vpop.eup %2088 }
 0x2a8   : > { %v1692_v8 = vmul.f32 %v2089_v25, %v1686_v34 }
 0x2aa   : > { %1693 = vst [vmem:[%s767_s19] sm:$0xff] %v1692_v8 }
 0x2ab PF: > { %s1829_s12 = sshll.u32 %s2186_s15, 7  ;;  %s1708_s26 = sshll.u32 %s767_s19, 4  ;;  %s1709_s26 = int_to_ptr.vmem [resolvable:$true] %s1708_s26 }
 0x2ac   : > { %s1706_s24 = scalar_lea.hbm %s3051_s2, %s1829_s12  ;;  %s1695_s25 = scalar_lea.sflag [#allocation7], %s765_s28 }
 0x2ad   : > { %s2090_s23 = scalar_lea.vmem %s1709_s26, 128  ;;  %s2203_s29 = smov [#allocation6]  }
 0x2ae   : > { %p2091_p5 = scmp.ne.s32.totalorder %s1709_s26, %s2090_s23  ;;  %s2094_s5 = sshll.u32 %s2203_s29, 4  ;;  %s2095_s5 = int_to_ptr.vmem [resolvable:$false] %s2094_s5 }
 0x2af   : > { %s2096_s7 = scalar_lea.vmem %s2095_s5, 256  ;;  %p2097_p9 = scmp.lt.s32.totalorder %s1709_s26, %s2095_s5 }
 0x2b0   : > { %p2092_p6 = pnand %p2091_p5, %p2291_p7  ;;  %p2098_p10 = scmp.lt.s32.totalorder %s2096_s7, %s2090_s23 }
 0x2b2   : > { %p2093_p8 = pneg %p2092_p6  ;;  %p2099_p11 = por %p2098_p10, %p2097_p9 }
 0x2b4   : > { %p2100_p13 = pnand %p2099_p11, %p2093_p8 }
 0x2b6   : > { %2103 = shalt.err (!%p2100_p13)
}
 0x2b7   : > { %s2104_s15 = scalar_lea.hbm %s1706_s24, 128  ;;  %s2108_s8 = scalar_lea.hbm %s3051_s2, 256 }
 0x2b8   : > { %p2105_p0 = scmp.ne.s32.totalorder %s1706_s24, %s2104_s15  ;;  %p2109_p3 = scmp.lt.s32.totalorder %s1706_s24, %s3051_s2 }
 0x2b9   : > { %p2110_p4 = scmp.lt.s32.totalorder %s2108_s8, %s2104_s15 }
 0x2ba   : > { %p2106_p1 = pnand %p2105_p0, %p2291_p7 }
 0x2bb   : > { %p2111_p5 = por %p2110_p4, %p2109_p3 }
 0x2bc   : > { %p2107_p2 = pneg %p2106_p1 }
 0x2be   : > { %p2112_p6 = pnand %p2111_p5, %p2107_p2 }
 0x2c0   : > { %2115 = shalt.err (!%p2112_p6)
}
 0x2c1   : > { %1993 = dma.vmem_to_hbm [thread:$0]  (%p2291_p7), %s1709_s26, 128, %s1706_s24, %s1695_s25  }
 0x2c2 PF: > { %p1999_p8 = scmp.ge.s32.totalorder %s2198_s18, 2  ;;  %s1720_s14 = sand.u32 1, %s2162_s9  }
 0x2c3   : > { %s1721_s20 = scalar_lea.sflag [#allocation7], %s1720_s14 }
 0x2c4   : > { %p1996_p9 = pnand %p1999_p8, %p2299_p12 }
 0x2c6   : > { %p1997_p10 = pneg %p1996_p9 }
 0x2c8   : > { %2157 = dma.done.wait (%p1997_p10), %s1721_s20, 128  }
 0x2c9   : > { %2159 = vsyncadd (%p1997_p10), %s1721_s20, 4294967168  ;;  %s15_s18 = sadd.s32 1, %s2198_s18   ;;  %s3064_s9 = smov %s2166_s10 }
 0x2ca   : > { %p12_p11 = scmp.ge.s32.totalorder %s15_s18, 6   ;;  %s3065_s10 = smov %s2170_s11 }
 0x2cb   : > { %s3066_s11 = smov %s2304_s3  ;;  %s3067_s12 = smov %s2178_s13 }
 0x2cc   : > { %s3068_s13 = smov %s2307_s4  ;;  %s3069_s14 = smov %s2190_s16 }
 0x2cd   : > { %s3070_s15 = smov %s2194_s17  ;;  %s3071_s16 = smov %s3074_s21 }
 0x2ce   : > { %s3072_s17 = smov %s3078_s22  ;;  %14 = sbr.rel (!%p12_p11) target bundleno = 6 (0x6), region = 163 }
 0x2d3   :  { %1726 = vsyncpa [#allocation7], 1 }
 0x2d4   :  { %1728 = vsyncpa [#allocation7 + $0x1], 1 }

</bundles_post_ra>
